<compile_context>
chip_gen: v5e
topology: v5e:2x2
jax: 0.10.0
libtpu: 0.0.40
codegen_flags: <defaults>
</compile_context>

<pallas_src>
import jax
import jax.numpy as jnp
from jax import lax
from jax.experimental import pallas as pl
from jax.experimental.pallas import tpu as pltpu


# Set to jnp.bfloat16 on v6e/v7x to run the MXU matmuls at full bf16 rate (halves operand
# VMEM/DMA for the score matmul); kept float32 here to preserve f32 parity with PyTorch.
MXU_DTYPE = jnp.float32


def _pick_tile(dim, candidates):
    for c in candidates:
        if c <= dim and dim % c == 0:
            return c
    return dim


# ----------------------------------------------------------------------------
# Kernel 1: one hypergraph propagation layer:  F.normalize(adj @ x) + x
#   grid = (rows/tm, cols/tk); col axis is the reduction ("arbitrary").
# ----------------------------------------------------------------------------
def _hyper_kernel(adj_ref, xk_ref, xi_ref, o_ref, acc_ref):
    kk = pl.program_id(1)

    @pl.when(kk == 0)
    def _():
        acc_ref[...] = jnp.zeros_like(acc_ref)

    acc_ref[...] += jnp.dot(adj_ref[...], xk_ref[...],
                            preferred_element_type=jnp.float32)

    @pl.when(kk == pl.num_programs(1) - 1)
    def _():
        y = acc_ref[...]
        ss = jnp.sum(y * y, axis=-1, keepdims=True)
        # F.normalize: y / max(||y||, 1e-12) == y * rsqrt(max(||y||^2, 1e-24))
        o_ref[...] = y * lax.rsqrt(jnp.maximum(ss, 1e-24)) + xi_ref[...]


def hypergraph_layer(adj, x):
    m, h = x.shape
    tm = _pick_tile(m, (256, 128, 64, 32, 16, 8))
    tk = _pick_tile(m, (256, 128))          # lane-axis tile: multiple of 128 or full dim
    return pl.pallas_call(
        _hyper_kernel,
        out_shape=jax.ShapeDtypeStruct((m, h), jnp.float32),
        grid=(m // tm, m // tk),
        in_specs=[
            pl.BlockSpec((tm, tk), lambda i, k: (i, k)),   # adj tile
            pl.BlockSpec((tk, h), lambda i, k: (k, 0)),    # x rows for the matmul
            pl.BlockSpec((tm, h), lambda i, k: (i, 0)),    # x rows for the residual
        ],
        out_specs=pl.BlockSpec((tm, h), lambda i, k: (i, 0)),
        scratch_shapes=[pltpu.VMEM((tm, h), jnp.float32)],
        compiler_params=pltpu.CompilerParams(
            dimension_semantics=("parallel", "arbitrary")),
    )(adj, x, x)


# ----------------------------------------------------------------------------
# Kernel 2: ConvTransE feature path (per context, per N tile)
#   conv1d(2->C, k=3, pad=1) via pltpu.roll taps -> relu -> fc (one long matmul) -> relu
# ----------------------------------------------------------------------------
def _convtranse_feat_kernel(convw_ref, convb_ref,             # SMEM scalar tables
                            e1_ref, rel_ref, fcw_ref, fcb_ref,  # VMEM
                            feat_ref):
    k = pl.program_id(0)
    e1 = e1_ref[0]                                 # (N_t, H); tanh applied once in glue
    rg = rel_ref[0]                                # (N_t, H); no tanh (matches PyTorch)
    nt, h = e1.shape
    c_chan = fcw_ref.shape[1] // h

    lane = lax.broadcasted_iota(jnp.int32, (nt, h), 1)

    def taps(x):
        # cross-correlation taps with zero padding: x[l-1], x[l], x[l+1]
        left = jnp.where(lane == 0, 0.0, pltpu.roll(x, shift=1, axis=1))
        right = jnp.where(lane == h - 1, 0.0, pltpu.roll(x, shift=h - 1, axis=1))
        return (left, x, right)

    # order matches Conv1d weight layout (in_ch 0 = entity, in_ch 1 = relation; tap 0..2)
    xs = taps(e1) + taps(rg)

    chans = []
    for c in range(c_chan):
        acc = convb_ref[k, c] + jnp.zeros((nt, h), jnp.float32)
        for m in range(6):                          # flat index = c*6 + in_ch*3 + tap
            acc = acc + convw_ref[k, c * 6 + m] * xs[m]
        chans.append(jnp.maximum(acc, 0.0))         # bn1 (identity) + relu
    wide = jnp.concatenate(chans, axis=-1)          # (N_t, C*H), channel-major

    x = jnp.dot(wide.astype(MXU_DTYPE), fcw_ref[0].astype(MXU_DTYPE),
                preferred_element_type=jnp.float32) + fcb_ref[0]
    feat_ref[0] = jnp.maximum(x, 0.0)               # bn2 (identity) + relu


def convtranse_features(e1, rel, conv_w, conv_b, fc_w, fc_b, *, n_tile):
    k_ctx, n_pad, h = e1.shape
    ch = fc_w.shape[1]
    return pl.pallas_call(
        _convtranse_feat_kernel,
        out_shape=jax.ShapeDtypeStruct((k_ctx, n_pad, h), jnp.float32),
        grid=(k_ctx, n_pad // n_tile),
        in_specs=[
            pl.BlockSpec(memory_space=pltpu.MemorySpace.SMEM),        # conv_w (K, C*6)
            pl.BlockSpec(memory_space=pltpu.MemorySpace.SMEM),        # conv_b (K, C)
            pl.BlockSpec((1, n_tile, h), lambda k, n: (k, n, 0)),     # e1 (tanh'd) rows
            pl.BlockSpec((1, n_tile, h), lambda k, n: (k, n, 0)),     # rel rows
            pl.BlockSpec((1, ch, h), lambda k, n: (k, 0, 0)),         # fc W.T (C*H, H)
            pl.BlockSpec((1, 1, h), lambda k, n: (k, 0, 0)),          # fc bias
        ],
        out_specs=pl.BlockSpec((1, n_tile, h), lambda k, n: (k, n, 0)),
        compiler_params=pltpu.CompilerParams(
            dimension_semantics=("parallel", "parallel"),
            vmem_limit_bytes=48 * 1024 * 1024),
    )(conv_w, conv_b, e1, rel, fc_w, fc_b)


# ----------------------------------------------------------------------------
# Kernel 3: fused score matmul + context-weighted sum over K + cross-entropy
#   grid = (N tile, E tile, K); K accumulates weighted scores, E tiles feed an online
#   log-sum-exp; per-row CE (masked for padding) is written at the last (E, K) step.
# ----------------------------------------------------------------------------
def _score_ce_kernel(feat_ref, eallt_ref, ctx_ref, tgt_ref, ce_ref,
                     acc_ref, m_ref, l_ref, tl_ref):
    e_j = pl.program_id(1)
    k = pl.program_id(2)
    e_last = pl.num_programs(1) - 1
    k_last = pl.num_programs(2) - 1

    @pl.when(jnp.logical_and(e_j == 0, k == 0))
    def _():
        m_ref[...] = jnp.full_like(m_ref, -jnp.inf)
        l_ref[...] = jnp.zeros_like(l_ref)
        tl_ref[...] = jnp.zeros_like(tl_ref)

    @pl.when(k == 0)
    def _():
        acc_ref[...] = jnp.zeros_like(acc_ref)

    # ctx-weight the features (linear in the matmul), accumulate over contexts.
    x = feat_ref[0] * ctx_ref[0]                              # (N_t, H)
    acc_ref[...] += jnp.dot(x.astype(MXU_DTYPE), eallt_ref[0].astype(MXU_DTYPE),
                            preferred_element_type=jnp.float32)

    @pl.when(k == k_last)
    def _():
        s = acc_ref[...]                                      # final (N_t, E_t) scores
        et = s.shape[1]
        col = e_j * et + lax.broadcasted_iota(jnp.int32, s.shape, 1)
        tgt = tgt_ref[...]                                    # (N_t, 1) int32; -1 => pad
        tl_ref[...] += jnp.sum(jnp.where(col == tgt, s, 0.0), axis=-1, keepdims=True)

        m_prev = m_ref[...]
        m_new = jnp.maximum(m_prev, jnp.max(s, axis=-1, keepdims=True))
        l_ref[...] = (l_ref[...] * jnp.exp(m_prev - m_new)
                      + jnp.sum(jnp.exp(s - m_new), axis=-1, keepdims=True))
        m_ref[...] = m_new

        @pl.when(e_j == e_last)
        def _():
            lse = m_ref[...] + jnp.log(l_ref[...])
            valid = (tgt >= 0).astype(jnp.float32)
            ce_ref[...] = (lse - tl_ref[...]) * valid         # masked per-row CE


def weighted_score_ce(feat, eall_t, ctx_k, tgt, *, n_tile, e_tile):
    k_ctx, n_pad, h = feat.shape
    e_tot = eall_t.shape[2]
    return pl.pallas_call(
        _score_ce_kernel,
        out_shape=jax.ShapeDtypeStruct((n_pad, 1), jnp.float32),
        grid=(n_pad // n_tile, e_tot // e_tile, k_ctx),
        in_specs=[
            pl.BlockSpec((1, n_tile, h), lambda n, e, k: (k, n, 0)),    # features
            pl.BlockSpec((1, h, e_tile), lambda n, e, k: (k, 0, e)),    # tanh'd E table^T
            pl.BlockSpec((1, n_tile, 1), lambda n, e, k: (k, n, 0)),    # context weights
            pl.BlockSpec((n_tile, 1), lambda n, e, k: (n, 0)),          # targets
        ],
        out_specs=pl.BlockSpec((n_tile, 1), lambda n, e, k: (n, 0)),
        scratch_shapes=[
            pltpu.VMEM((n_tile, e_tile), jnp.float32),   # weighted-score accumulator
            pltpu.VMEM((n_tile, 1), jnp.float32),        # running max (online LSE)
            pltpu.VMEM((n_tile, 1), jnp.float32),        # running sum (online LSE)
            pltpu.VMEM((n_tile, 1), jnp.float32),        # target logit
        ],
        compiler_params=pltpu.CompilerParams(
            dimension_semantics=("parallel", "arbitrary", "arbitrary"),
            vmem_limit_bytes=48 * 1024 * 1024),
    )(feat, eall_t, ctx_k, tgt)


# ----------------------------------------------------------------------------
# Glue (reshapes / gathers / parameter plumbing)
# ----------------------------------------------------------------------------
def seco_forward(params, test_triples, test_contexts, cfg):
    K, E, H, R = cfg["k_contexts"], cfg["num_ents"], cfg["h_dim"], cfg["num_rels"]

    # predict(): inverse triples and context weights
    inv = jnp.stack([test_triples[:, 2], test_triples[:, 1] + R, test_triples[:, 0]], axis=1)
    all_triples = jnp.concatenate([test_triples, inv], axis=0)            # (N, 3)
    all_ctx = jnp.concatenate([test_contexts, test_contexts], axis=0)     # (N, K)
    n_true = all_triples.shape[0]

    # get_embs() with empty graph history (g_list == []); layer_norm=False
    ent = params["dynamic_emb"]                                           # (K, E, H)
    rel = params["emb_rel"]                                               # (K, 2R, H)

    # hypergraph propagation (entity-major flattening, as in the PyTorch code)
    ent_flat = jnp.transpose(ent, (1, 0, 2)).reshape(E * K, H)
    for _ in range(cfg["n_layers_hypergraph_ent"]):
        ent_flat = hypergraph_layer(params["hyper_adj_ent"], ent_flat)
    ent = jnp.transpose(ent_flat.reshape(E, K, H), (1, 0, 2))

    rel_flat = jnp.transpose(rel, (1, 0, 2)).reshape(2 * R * K, H)
    for _ in range(cfg["n_layers_hypergraph_rel"]):
        rel_flat = hypergraph_layer(params["hyper_adj_rel"], rel_flat)
    rel = jnp.transpose(rel_flat.reshape(2 * R, K, H), (1, 0, 2))

    pre_emb = ent                                                         # layer_norm=False

    # tile choices (overridable through cfg); pad N to the tile size
    n_tile = int(cfg.get("n_tile", 0))
    if n_tile <= 0:
        n_pad0 = -(-n_true // 8) * 8
        n_tile = _pick_tile(n_pad0, (256, 128, 64, 32, 16, 8))
    n_pad = -(-n_true // n_tile) * n_tile
    e_tile = int(cfg.get("e_tile", 0)) or _pick_tile(E, (512, 256, 128))

    s_idx = all_triples[:, 0]
    r_idx = all_triples[:, 1]
    tgt = all_triples[:, 2].astype(jnp.int32)
    ctx = all_ctx.astype(jnp.float32)
    pad = n_pad - n_true
    if pad:
        s_idx = jnp.concatenate([s_idx, jnp.zeros((pad,), s_idx.dtype)])
        r_idx = jnp.concatenate([r_idx, jnp.zeros((pad,), r_idx.dtype)])
        tgt = jnp.concatenate([tgt, jnp.full((pad,), -1, jnp.int32)])     # -1 => masked
        ctx = jnp.concatenate([ctx, jnp.zeros((pad, K), jnp.float32)], axis=0)

    # hoist tanh of the entity table (used by both the e1 gather and the score matmul)
    pre_tanh = jnp.tanh(pre_emb)                                          # (K, E, H)
    e1 = pre_tanh[:, s_idx, :]                                            # (K, Np, H)
    rg = rel[:, r_idx, :]                                                 # (K, Np, H)
    eall_t = jnp.transpose(pre_tanh, (0, 2, 1))                           # (K, H, E)

    feat = convtranse_features(e1, rg, params["conv_w"], params["conv_b"],
                               params["fc_w"], params["fc_b"],
                               n_tile=n_tile)                             # (K, Np, H)

    ce = weighted_score_ce(feat, eall_t,
                           jnp.transpose(ctx, (1, 0))[:, :, None],        # (K, Np, 1)
                           tgt[:, None],                                  # (Np, 1)
                           n_tile=n_tile, e_tile=e_tile)                  # (Np, 1)

    return jnp.sum(ce) / n_true                                           # mean CE over 2T


if __name__ == "__main__":
    # small, module-consistent shapes (h_dim kept a multiple of 128 per TPU layout rules)
    K, E, R, H, C, T = 2, 256, 8, 128, 8, 8
    cfg = dict(k_contexts=K, num_ents=E, num_rels=R, h_dim=H,
               n_layers_hypergraph_ent=2, n_layers_hypergraph_rel=2,
               n_tile=8, e_tile=128)   # small tiles so the demo exercises multi-tile paths

    key = jax.random.PRNGKey(0)
    ks = jax.random.split(key, 10)

    params = {
        "emb_rel": 0.1 * jax.random.normal(ks[0], (K, 2 * R, H), jnp.float32),
        "dynamic_emb": jax.random.normal(ks[1], (K, E, H), jnp.float32),
        # Conv1d(2, C, 3, padding=1) weights flattened (C, in_ch, tap) row-major per ctx
        "conv_w": 0.1 * jax.random.normal(ks[2], (K, C * 6), jnp.float32),
        "conv_b": jnp.zeros((K, C), jnp.float32),
        # fc weight stored transposed per ctx: (C*H, H) == decoders[k].fc.weight.T
        "fc_w": jax.random.normal(ks[3], (K, C * H, H), jnp.float32) / (C * H) ** 0.5,
        "fc_b": jnp.zeros((K, 1, H), jnp.float32),
    }
    adj_e = jax.random.uniform(ks[4], (E * K, E * K), jnp.float32)
    params["hyper_adj_ent"] = adj_e / jnp.sum(adj_e, axis=1, keepdims=True)
    adj_r = jax.random.uniform(ks[5], (2 * R * K, 2 * R * K), jnp.float32)
    params["hyper_adj_rel"] = adj_r / jnp.sum(adj_r, axis=1, keepdims=True)

    s = jax.random.randint(ks[6], (T,), 0, E)
    r = jax.random.randint(ks[7], (T,), 0, R)
    o = jax.random.randint(ks[8], (T,), 0, E)
    test_triples = jnp.stack([s, r, o], axis=1).astype(jnp.int32)         # (T, 3)
    ctx_ids = jax.random.randint(ks[9], (T,), 0, K)
    test_contexts = jax.nn.one_hot(ctx_ids, K, dtype=jnp.float32)         # (T, K)

    loss = seco_forward(params, test_triples, test_contexts, cfg)
    jax.block_until_ready(loss)
    print("KERNEL_OK")
</pallas_src>

<mosaic_0001>
module attributes {stable_mosaic.version = 11 : i64} {
  func.func @_hyper_kernel(%arg0: i32, %arg1: i32, %arg2: memref<256x256xf32, #tpu.memory_space<vmem>>, %arg3: memref<256x128xf32, #tpu.memory_space<vmem>>, %arg4: memref<256x128xf32, #tpu.memory_space<vmem>>, %arg5: memref<256x128xf32, #tpu.memory_space<vmem>>, %arg6: memref<256x128xf32, #tpu.memory_space<vmem>>) attributes {dimension_semantics = [#tpu.dimension_semantics<parallel>, #tpu.dimension_semantics<arbitrary>], iteration_bounds = array<i64: 2, 2>, scalar_prefetch = 0 : i64, scratch_operands = 1 : i64, tpu.core_type = #tpu.core_type<tc>, window_params = [{transform_indices = @transform_0, window_bounds = array<i64: 256, 256>}, {transform_indices = @transform_1, window_bounds = array<i64: 256, 128>}, {transform_indices = @transform_2, window_bounds = array<i64: 256, 128>}, {transform_indices = @transform_3, window_bounds = array<i64: 256, 128>}]} {
    %c0_i32 = arith.constant 0 : i32
    %0 = arith.cmpi eq, %arg1, %c0_i32 : i32
    %1 = arith.extui %0 : i1 to i32
    %c0_i32_0 = arith.constant 0 : i32
    %2 = arith.cmpi ne, %1, %c0_i32_0 : i32
    scf.if %2 {
      %cst_9 = arith.constant 0.000000e+00 : f32
      %12 = vector.broadcast %cst_9 : f32 to vector<256x128xf32>
      %c0_10 = arith.constant 0 : index
      %c0_11 = arith.constant 0 : index
      %13 = vector.load %arg6[%c0_10, %c0_11] : memref<256x128xf32, #tpu.memory_space<vmem>>, vector<256x128xf32>
      tpu.vector_store %arg6[%c0_10, %c0_11], %12 {strides = array<i32>} : memref<256x128xf32, #tpu.memory_space<vmem>>, vector<256x128xf32>,
    } else {
    }
    %c0 = arith.constant 0 : index
    %c0_1 = arith.constant 0 : index
    %3 = vector.load %arg6[%c0, %c0_1] : memref<256x128xf32, #tpu.memory_space<vmem>>, vector<256x128xf32>
    %c0_2 = arith.constant 0 : index
    %c0_3 = arith.constant 0 : index
    %4 = vector.load %arg2[%c0_2, %c0_3] : memref<256x256xf32, #tpu.memory_space<vmem>>, vector<256x256xf32>
    %c0_4 = arith.constant 0 : index
    %c0_5 = arith.constant 0 : index
    %5 = vector.load %arg3[%c0_4, %c0_5] : memref<256x128xf32, #tpu.memory_space<vmem>>, vector<256x128xf32>
    %cst = arith.constant dense<0.000000e+00> : vector<256x128xf32>
    %6 = tpu.matmul %4, %5, %cst {dimension_numbers = #tpu.dot_dimension_numbers<[1], [0], [0], [1], [0, 0, 1, 1], [], []>} : vector<256x256xf32>, vector<256x128xf32>, vector<256x128xf32> -> vector<256x128xf32>
    %7 = arith.addf %3, %6 : vector<256x128xf32>
    %c0_6 = arith.constant 0 : index
    %c0_7 = arith.constant 0 : index
    %8 = vector.load %arg6[%c0_6, %c0_7] : memref<256x128xf32, #tpu.memory_space<vmem>>, vector<256x128xf32>
    tpu.vector_store %arg6[%c0_6, %c0_7], %7 {strides = array<i32>} : memref<256x128xf32, #tpu.memory_space<vmem>>, vector<256x128xf32>,
    %c1_i32 = arith.constant 1 : i32
    %9 = arith.cmpi eq, %arg1, %c1_i32 : i32
    %10 = arith.extui %9 : i1 to i32
    %c0_i32_8 = arith.constant 0 : i32
    %11 = arith.cmpi ne, %10, %c0_i32_8 : i32
    scf.if %11 {
      %c0_9 = arith.constant 0 : index
      %c0_10 = arith.constant 0 : index
      %12 = vector.load %arg6[%c0_9, %c0_10] : memref<256x128xf32, #tpu.memory_space<vmem>>, vector<256x128xf32>
      %13 = arith.mulf %12, %12 : vector<256x128xf32>
      %cst_11 = arith.constant dense<0.000000e+00> : vector<256xf32>
      %14 = vector.multi_reduction <add>, %13, %cst_11 [1] : vector<256x128xf32> to vector<256xf32>
      %15 = vector.shape_cast %14 : vector<256xf32> to vector<256x1xf32>
      %cst_12 = arith.constant 1.000000e-24 : f32
      %16 = vector.broadcast %cst_12 : f32 to vector<256x1xf32>
      %17 = arith.maximumf %15, %16 : vector<256x1xf32>
      %18 = math.rsqrt %17 : vector<256x1xf32>
      %19 = vector.broadcast %18 : vector<256x1xf32> to vector<256x128xf32>
      %20 = arith.mulf %12, %19 : vector<256x128xf32>
      %c0_13 = arith.constant 0 : index
      %c0_14 = arith.constant 0 : index
      %21 = vector.load %arg4[%c0_13, %c0_14] : memref<256x128xf32, #tpu.memory_space<vmem>>, vector<256x128xf32>
      %22 = arith.addf %20, %21 : vector<256x128xf32>
      %c0_15 = arith.constant 0 : index
      %c0_16 = arith.constant 0 : index
      %23 = vector.load %arg5[%c0_15, %c0_16] : memref<256x128xf32, #tpu.memory_space<vmem>>, vector<256x128xf32>
      tpu.vector_store %arg5[%c0_15, %c0_16], %22 {strides = array<i32>} : memref<256x128xf32, #tpu.memory_space<vmem>>, vector<256x128xf32>,
    } else {
    }
    return
  }
  func.func @transform_0(%arg0: i32, %arg1: i32) -> (i32, i32) {
    %c0_i32 = arith.constant 0 : i32
    return %arg0, %arg1 : i32, i32
  }
  func.func @transform_1(%arg0: i32, %arg1: i32) -> (i32, i32) {
    %c0_i32 = arith.constant 0 : i32
    %c0_i32_0 = arith.constant 0 : i32
    return %arg1, %c0_i32 : i32, i32
  }
  func.func @transform_2(%arg0: i32, %arg1: i32) -> (i32, i32) {
    %c0_i32 = arith.constant 0 : i32
    %c0_i32_0 = arith.constant 0 : i32
    return %arg0, %c0_i32 : i32, i32
  }
  func.func @transform_3(%arg0: i32, %arg1: i32) -> (i32, i32) {
    %c0_i32 = arith.constant 0 : i32
    %c0_i32_0 = arith.constant 0 : i32
    return %arg0, %c0_i32 : i32, i32
  }
}

</mosaic_0001>

<bundles_post_ra>
// kernel: tpu_custom_call.1
= control target key start
LH: loop header
LB: loop body
LE: loop exit
PB: predicated region body
PF: predicated region fallthrough
CT: control target
= control target key end

     0   :  { %s3116_s0 = inlined_call_operand.hbm [shape: f32[512,512], index: 0, kind: input, shape index: {}]   ;;  %s3117_s1 = inlined_call_operand.hbm [shape: f32[512,128], index: 1, kind: input, shape index: {}]   ;;  %s3118_s2 = inlined_call_operand.hbm [shape: f32[512,128], index: 2, kind: input, shape index: {}]   ;;  %s3119_s3 = inlined_call_operand.hbm [shape: f32[512,128], index: 3, kind: output, shape index: {}]  }
   0x1   :  { %3128 = sst [smem:[#allocation21_spill]] %s3116_s0 }
   0x2   :  { %3129 = sst [smem:[#allocation22_spill]] %s3117_s1 }
   0x3   :  { %3130 = sst [smem:[#allocation23_spill]] %s3119_s3 }
   0x4   :  { %8 = vsyncpa [#allocation4], 0 }
   0x5   :  { %10 = vsyncpa [#allocation4 + $0x1], 0 }
   0x6   :  { %11 = vsyncpa [#allocation7], 0 }
   0x7   :  { %13 = vsyncpa [#allocation7 + $0x1], 0 }
   0x8   :  { %14 = vsyncpa [#allocation5], 0 }
   0x9   :  { %16 = vsyncpa [#allocation5 + $0x1], 0  ;;  %s2057_s12 = smov 0   ;;  %s2059_s13 = smov 0  }
   0xa   :  { %s2061_s14 = smov 0   ;;  %s2063_s15 = smov 0  }
   0xb   :  { %s2065_s16 = smov 0   ;;  %s2067_s17 = smov 0  }
   0xc   :  { %s2069_s18 = smov 0   ;;  %s2071_s19 = smov 0  }
   0xd   :  { %s2073_s20 = smov 0   ;;  %s2075_s21 = smov 0  }
   0xe   :  { %s2077_s22 = smov 0   ;;  %s2079_s23 = smov 0  }
   0xf   :  { %s2081_s24 = smov 0   ;;  %s2083_s25 = smov 0  }
  0x10 LB: > { %3131 = sst [smem:[#allocation14_spill]] %s1995_s17  ;;  %s2128_s26 = sadd.s32 4294967295, %s2027_s25   ;;  %s2027_s25 = sphi %s2083_s25, %s22_s25   ;;  %s2023_s24 = sphi %s2081_s24, %s3175_s24   ;;  %s2019_s23 = sphi %s2079_s23, %s3174_s23   ;;  %s2015_s22 = sphi %s2077_s22, %s3173_s22   ;;  %s2011_s21 = sphi %s2075_s21, %s3172_s21   ;;  %s2007_s20 = sphi %s2073_s20, %s3160_s20   ;;  %s2003_s19 = sphi %s2071_s19, %s3171_s19   ;;  %s1999_s18 = sphi %s2069_s18, %s3170_s18   ;;  %s1995_s17 = sphi %s2067_s17, %s3158_s17   ;;  %s1991_s16 = sphi %s2065_s16, %s3169_s16   ;;  %s1987_s15 = sphi %s2063_s15, %s3168_s15   ;;  %s1983_s14 = sphi %s2061_s14, %s3167_s14   ;;  %s1979_s13 = sphi %s2059_s13, %s3166_s13   ;;  %s1975_s12 = sphi %s2057_s12, %s3165_s12  }
  0x11   : > { %3132 = sst [smem:[#allocation15_spill]] %s2007_s20  ;;  %s31_s27 = sadd.s32 1, %s2019_s23 }
  0x12   : > { %3133 = sst [smem:[#allocation16_spill]] %s2019_s23  ;;  %p32_p0 = scmp.ge.s32.totalorder %s31_s27, 2 }
  0x13   : > { %s34_s28 = sadd.s32 1, %s2023_s24  ;;  %p51_p1 = scmp.eq.s32.totalorder %s2027_s25, 0 }
  0x14   : > { %p57_p2 = scmp.eq.s32.totalorder %s2128_s26, 0  ;;  %s3177_s27 = smov (%p32_p0, %s31_s27), 0 }
  0x15   : > { %3134 = sst [smem:[#allocation17_spill]] %s3177_s27  ;;  %s3179_s28 = smov (!%p32_p0, %s34_s28), %s2023_s24 }
  0x16   : > { %s39_s29 = ssub.s32 %s2019_s23, %s3177_s27  ;;  %s69_s30 = sadd.s32 1, %s1995_s17 }
  0x17   : > { %p36_p3 = scmp.ge.s32.totalorder %s3179_s28, 2  ;;  %p67_p4 = scmp.eq.s32.totalorder %s39_s29, 0 }
  0x18   : > { %p76_p5 = scmp.ne.s32.totalorder %s1995_s17, %s1991_s16  ;;  %p82_p6 = scmp.ne.s32.totalorder %s1991_s16, %s1987_s15 }
  0x19   : > { %s3181_s28 = smov (%p36_p3, %s3179_s28), 0  ;;  %p1591_p11 = scmp.lt.s32.totalorder %s2027_s25, 4 }
  0x1a   : > { %3135 = sst [smem:[#allocation18_spill]] %s3181_s28  ;;  %s2151_s5 = ssub.s32 %s2023_s24, %s3181_s28 }
  0x1b   : > { %s2147_s4 = scalar_select %p67_p4, %s1995_s17, %s69_s30  }
  0x1c   : > { %p2155_p7 = por %p76_p5, %p51_p1  ;;  %s40_s7 = sor.u32 %s39_s29, %s2151_s5 }
  0x1d   : > { %3136 = sst [smem:[#allocation19_spill]] %s2147_s4  ;;  %p2162_p8 = por %p82_p6, %p57_p2 }
  0x1e   : > { %p2166_p9 = scmp.eq.s32.totalorder %s40_s7, 0  ;;  %p93_p10 = scmp.eq.s32.totalorder %s2151_s5, 0 }
  0x1f   : > { %s183_s10 = sand.u32 1, %s2027_s25   ;;  %s185_s11 = sand.u32 1, %s1995_s17  }
  0x20   : > { %s1515_s15 = sshll.u32 %s185_s11, 8  ;;  %s1534_s30 = sshll.u32 %s2019_s23, 8 }
  0x21   : > { %s3140_s1 = sld [smem:[#allocation22_spill]]  ;;  %s187_s7 = scalar_lea.vmem [#allocation6], %s1515_s15 }
  0x22   : > { %s195_s4 = sshll.u32 %s187_s7, 4  ;;  %p1581_p12 = pnand %p1591_p11, %p2155_p7  ;;  %s196_s4 = int_to_ptr.vmem [resolvable:$true] %s195_s4 }
  0x23   : > { %p1521_p13 = scmp.ge.s32.totalorder %s2027_s25, 1  ;;  %s2183_s28 = scalar_lea.sflag [#allocation7], %s183_s10 }
  0x24   : > { %s3123_s11 = smov 128   ;;  %s3124_s15 = smov 8  }
  0x25   : > { %p225_p0 = scmp.lt.s32.totalorder %s2027_s25, 5  ;;  %s43_s6 = sadd.s32 1, %s2007_s20 }
  0x26   : > { %p50_p4 = scmp.ne.s32.totalorder %s2007_s20, %s2003_s19  ;;  %p56_p6 = scmp.ne.s32.totalorder %s2003_s19, %s1999_s18 }
  0x27   : > { %s192_s27 = scalar_lea.hbm %s3140_s1, %s1534_s30  ;;  %p2190_p3 = pnand %p1521_p13, %p225_p0 }
  0x28   : > { %s193_s3 = sshll.u32 %s192_s27, 4  ;;  %p2204_p5 = por %p51_p1, %p50_p4  ;;  %s194_s3 = int_to_ptr.hbm [resolvable:$true] %s193_s3 }
  0x29   : > { %1583 = dma.hbm_to_vmem [thread:$0]  (!%p1581_p12), %s194_s3, 4096, %s196_s4, %s2183_s28, %s3123_s11, %s3123_s11, %s3124_s15  }
  0x2a   : > { %s2200_s30 = scalar_select %p2166_p9, %s2007_s20, %s43_s6  }
  0x2b   : > { %s158_s29 = sand.u32 1, %s2007_s20   ;;  %s1512_s3 = sshll.u32 %s2019_s23, 1 }
  0x2c   : > { %3142 = sst [smem:[#allocation20_spill]] %s2200_s30  ;;  %p2214_p7 = por %p57_p2, %p56_p6 }
  0x2d   : > { %s1510_s7 = sshll.u32 %s158_s29, 9  ;;  %s1533_s9 = sshll.u32 %s2023_s24, 7 }
  0x2e   : > { %s168_s6 = sadd.s32 %s1533_s9, %s1512_s3  ;;  %s162_s15 = scalar_lea.vmem [#allocation3], %s1510_s7 }
  0x2f   : > { %s1514_s11 = sshll.u32 %s168_s6, 3  ;;  %s173_s18 = sshll.u32 %s162_s15, 4  ;;  %s174_s18 = int_to_ptr.vmem [resolvable:$true] %s173_s18 }
  0x30   : > { %s3145_s0 = sld [smem:[#allocation21_spill]]  ;;  %p1578_p9 = pnand %p1591_p11, %p2204_p5 }
  0x31   : > { %s159_s3 = scalar_lea.sflag [#allocation4], %s158_s29  ;;  %s2031_s9 = smov 512  }
  0x32   : > { %s2032_s7 = smov 256   ;;  %s2033_s15 = smov 16  }
  0x33   : > { %s1507_s6 = sadd.s32 4294967294, %s2027_s25   ;;  %s95_s1 = sadd.s32 1, %s1983_s14 }
  0x34   : > { %p102_p12 = scmp.ne.s32.totalorder %s1983_s14, %s1979_s13  ;;  %p108_p0 = scmp.ne.s32.totalorder %s1979_s13, %s1975_s12 }
  0x35   : > { %s2233_s23 = scalar_select %p93_p10, %s1983_s14, %s95_s1  }
  0x36   : > { %s170_s30 = scalar_lea.hbm %s3145_s0, %s1514_s11  ;;  %p2237_p13 = por %p102_p12, %p51_p1 }
  0x37   : > { %s171_s20 = sshll.u32 %s170_s30, 4  ;;  %p132_p4 = scmp.eq.s32.totalorder %s2128_s26, 3  ;;  %s172_s20 = int_to_ptr.hbm [resolvable:$true] %s171_s20 }
  0x38   : > { %1580 = dma.hbm_to_vmem [thread:$0]  (!%p1578_p9), %s172_s20, 8192, %s174_s18, %s159_s3, %s2031_s9, %s2032_s7, %s2033_s15  }
  0x39   : > { %p138_p5 = scmp.eq.s32.totalorder %s1507_s6, 3  ;;  %p2246_p6 = por %p108_p0, %p57_p2 }
  0x3a   : > { %s207_s30 = sand.u32 1, %s1983_s14   ;;  %p2251_p9 = por %p132_p4, %p102_p12 }
  0x3b   : > { %p2255_p1 = por %p138_p5, %p108_p0  ;;  %s1518_s29 = sshll.u32 %s207_s30, 8 }
  0x3c   : > { %s1535_s18 = sshll.u32 %s2023_s24, 8  ;;  %s209_s6 = scalar_lea.vmem [#allocation8], %s1518_s29 }
  0x3d   : > { %s214_s7 = scalar_lea.hbm %s3118_s2, %s1535_s18  ;;  %s217_s1 = sshll.u32 %s209_s6, 4  ;;  %s218_s1 = int_to_ptr.vmem [resolvable:$true] %s217_s1 }
  0x3e   : > { %s215_s15 = sshll.u32 %s214_s7, 4  ;;  %p1584_p2 = pnand %p1591_p11, %p2237_p13  ;;  %s216_s15 = int_to_ptr.hbm [resolvable:$true] %s215_s15 }
  0x3f   : > { %s3150_s0 = smov 8   ;;  %s3151_s17 = smov 128  }
  0x40   : > { %1586 = dma.hbm_to_vmem [thread:$0]  (!%p1584_p2), %s216_s15, 4096, %s218_s1, %s2183_s28, %s3151_s17, %s3151_s17, %s3150_s0  }
  0x41   : > { %229 = sbr.rel (%p2190_p3) target bundleno = 664 (0x298), region = 32  ;;  %s231_s30 = sand.u32 (!%p2190_p3), 1, %s2003_s19  }
  0x42   : > { %s1522_s3 = sshll.u32 (!%p2190_p3), %s231_s30, 9  ;;  %s232_s18 = scalar_lea.sflag (!%p2190_p3), [#allocation4], %s231_s30 }
  0x43   : > { %s2274_s9 = scalar_lea.vmem (!%p2190_p3), [#allocation3], %s1522_s3 }
  0x46   : > { %1958 = dma.done.wait (%p2214_p7), %s232_s18, 8192  }
  0x47   : > { %1960 = vsyncadd (%p2214_p7), %s232_s18, 4294959104  ;;  %s241_s11 = sand.u32 1, %s2128_s26   ;;  %s243_s0 = sand.u32 1, %s1991_s16  }
  0x48   : > { %s1523_s17 = sshll.u32 %s243_s0, 8  ;;  %s242_s28 = scalar_lea.sflag [#allocation7], %s241_s11 }
  0x49   : > { %s2282_s27 = scalar_lea.vmem [#allocation6], %s1523_s17 }
  0x4a   : > { %1962 = dma.done.wait (%p2162_p8), %s242_s28, 4096  }
  0x4b   : > { %1964 = vsyncadd (%p2162_p8), %s242_s28, 4294963200  ;;  %s253_s29 = sand.u32 1, %s1979_s13  }
  0x4c   : > { %s1524_s4 = sshll.u32 %s253_s29, 8 }
  0x4d   : > { %s2291_s7 = scalar_lea.vmem [#allocation8], %s1524_s4 }
  0x4e   : > { %1966 = dma.done.wait (%p2246_p6), %s242_s28, 4096  }
  0x4f   : > { %1968 = vsyncadd (%p2246_p6), %s242_s28, 4294963200  ;;  %s2297_s26 = scalar_lea.vmem [#allocation9], %s1524_s4  ;;  %p1526_p10 = scmp.ne.s32.totalorder %s2011_s21, 0 }
  0x51   : > { %297 = sbr.rel (%p1526_p10) target bundleno = 119 (0x77), region = 48 }
  0x56   : > { %v2034_v0 = vmov 0.0  }
  0x57   : > { %298 = vst [vmem:[#allocation2 + $0xb0] sm:$0xff] %v2034_v0 }
  0x58   : > { %299 = vst [vmem:[#allocation2] sm:$0xff] %v2034_v0 }
  0x59   : > { %300 = vst [vmem:[#allocation2 + $0xd8] sm:$0xff] %v2034_v0 }
  0x5a   : > { %301 = vst [vmem:[#allocation2 + $0x18] sm:$0xff] %v2034_v0 }
  0x5b   : > { %302 = vst [vmem:[#allocation2 + $0x50] sm:$0xff] %v2034_v0 }
  0x5c   : > { %303 = vst [vmem:[#allocation2 + $0x68] sm:$0xff] %v2034_v0 }
  0x5d   : > { %304 = vst [vmem:[#allocation2 + $0x30] sm:$0xff] %v2034_v0 }
  0x5e   : > { %305 = vst [vmem:[#allocation2 + $0x48] sm:$0xff] %v2034_v0 }
  0x5f   : > { %306 = vst [vmem:[#allocation2 + $0x80] sm:$0xff] %v2034_v0 }
  0x60   : > { %307 = vst [vmem:[#allocation2 + $0x88] sm:$0xff] %v2034_v0 }
  0x61   : > { %308 = vst [vmem:[#allocation2 + $0xe8] sm:$0xff] %v2034_v0 }
  0x62   : > { %309 = vst [vmem:[#allocation2 + $0xb8] sm:$0xff] %v2034_v0 }
  0x63   : > { %310 = vst [vmem:[#allocation2 + $0x60] sm:$0xff] %v2034_v0 }
  0x64   : > { %311 = vst [vmem:[#allocation2 + $0xf0] sm:$0xff] %v2034_v0 }
  0x65   : > { %312 = vst [vmem:[#allocation2 + $0x8] sm:$0xff] %v2034_v0 }
  0x66   : > { %313 = vst [vmem:[#allocation2 + $0x78] sm:$0xff] %v2034_v0 }
  0x67   : > { %314 = vst [vmem:[#allocation2 + $0x38] sm:$0xff] %v2034_v0 }
  0x68   : > { %315 = vst [vmem:[#allocation2 + $0x58] sm:$0xff] %v2034_v0 }
  0x69   : > { %316 = vst [vmem:[#allocation2 + $0x40] sm:$0xff] %v2034_v0 }
  0x6a   : > { %317 = vst [vmem:[#allocation2 + $0xc8] sm:$0xff] %v2034_v0 }
  0x6b   : > { %318 = vst [vmem:[#allocation2 + $0xe0] sm:$0xff] %v2034_v0 }
  0x6c   : > { %319 = vst [vmem:[#allocation2 + $0x90] sm:$0xff] %v2034_v0 }
  0x6d   : > { %320 = vst [vmem:[#allocation2 + $0x70] sm:$0xff] %v2034_v0 }
  0x6e   : > { %321 = vst [vmem:[#allocation2 + $0xc0] sm:$0xff] %v2034_v0 }
  0x6f   : > { %322 = vst [vmem:[#allocation2 + $0xa8] sm:$0xff] %v2034_v0 }
  0x70   : > { %323 = vst [vmem:[#allocation2 + $0xd0] sm:$0xff] %v2034_v0 }
  0x71   : > { %324 = vst [vmem:[#allocation2 + $0x10] sm:$0xff] %v2034_v0 }
  0x72   : > { %325 = vst [vmem:[#allocation2 + $0x28] sm:$0xff] %v2034_v0 }
  0x73   : > { %326 = vst [vmem:[#allocation2 + $0xa0] sm:$0xff] %v2034_v0 }
  0x74   : > { %327 = vst [vmem:[#allocation2 + $0xf8] sm:$0xff] %v2034_v0 }
  0x75   : > { %328 = vst [vmem:[#allocation2 + $0x20] sm:$0xff] %v2034_v0 }
  0x76   : > { %329 = vst [vmem:[#allocation2 + $0x98] sm:$0xff] %v2034_v0 }
  0x77 PF: > { %v441_v1 = vld [vmem:[%s2282_s27 + $0x78] sm:$0xff]  ;;  %v440_v3 = vld [vmem:[%s2282_s27 + $0x70] sm:$0xff]  ;;  %v439_v5 = vld [vmem:[%s2282_s27 + $0x68] sm:$0xff]  ;;  %p1527_p8 = scmp.ne.s32.totalorder %s2011_s21, 1 }
  0x78   : > { %v457_v2 = vld [vmem:[%s2282_s27 + $0xf8] sm:$0xff]  ;;  %1537 = vmatpush.msra.mxu2 %v441_v1  ;;  %v456_v4 = vld [vmem:[%s2282_s27 + $0xf0] sm:$0xff]  ;;  %v455_v6 = vld [vmem:[%s2282_s27 + $0xe8] sm:$0xff]  ;;  %458 = vmatpush.msra.mxu0 %v441_v1 }
  0x79   : > { %1553 = vmatpush.msra.mxu3 %v457_v2  ;;  %571 = vmatpush.msra.mxu1 %v457_v2  ;;  %v438_v7 = vld [vmem:[%s2282_s27 + $0x60] sm:$0xff]  ;;  %v437_v9 = vld [vmem:[%s2282_s27 + $0x58] sm:$0xff]  ;;  %v436_v11 = vld [vmem:[%s2282_s27 + $0x50] sm:$0xff] }
  0x7a   : > { %1538 = vmatpush.msra.mxu2 %v440_v3  ;;  %v454_v8 = vld [vmem:[%s2282_s27 + $0xe0] sm:$0xff]  ;;  %459 = vmatpush.msra.mxu0 %v440_v3  ;;  %v453_v10 = vld [vmem:[%s2282_s27 + $0xd8] sm:$0xff]  ;;  %v452_v12 = vld [vmem:[%s2282_s27 + $0xd0] sm:$0xff] }
  0x7b   : > { %1554 = vmatpush.msra.mxu3 %v456_v4  ;;  %572 = vmatpush.msra.mxu1 %v456_v4  ;;  %v435_v13 = vld [vmem:[%s2282_s27 + $0x48] sm:$0xff]  ;;  %v434_v15 = vld [vmem:[%s2282_s27 + $0x40] sm:$0xff]  ;;  %v433_v17 = vld [vmem:[%s2282_s27 + $0x38] sm:$0xff] }
  0x7c   : > { %1539 = vmatpush.msra.mxu2 %v439_v5  ;;  %460 = vmatpush.msra.mxu0 %v439_v5  ;;  %v451_v14 = vld [vmem:[%s2282_s27 + $0xc8] sm:$0xff]  ;;  %v450_v16 = vld [vmem:[%s2282_s27 + $0xc0] sm:$0xff]  ;;  %v449_v18 = vld [vmem:[%s2282_s27 + $0xb8] sm:$0xff] }
  0x7d   : > { %1555 = vmatpush.msra.mxu3 %v455_v6  ;;  %573 = vmatpush.msra.mxu1 %v455_v6  ;;  %v432_v19 = vld [vmem:[%s2282_s27 + $0x30] sm:$0xff]  ;;  %v431_v21 = vld [vmem:[%s2282_s27 + $0x28] sm:$0xff]  ;;  %v430_v23 = vld [vmem:[%s2282_s27 + $0x20] sm:$0xff] }
  0x7e   : > { %1540 = vmatpush.msra.mxu2 %v438_v7  ;;  %461 = vmatpush.msra.mxu0 %v438_v7  ;;  %v448_v20 = vld [vmem:[%s2282_s27 + $0xb0] sm:$0xff]  ;;  %v447_v22 = vld [vmem:[%s2282_s27 + $0xa8] sm:$0xff]  ;;  %v446_v24 = vld [vmem:[%s2282_s27 + $0xa0] sm:$0xff] }
  0x7f   : > { %1556 = vmatpush.msra.mxu3 %v454_v8  ;;  %574 = vmatpush.msra.mxu1 %v454_v8  ;;  %v429_v25 = vld [vmem:[%s2282_s27 + $0x18] sm:$0xff]  ;;  %v428_v27 = vld [vmem:[%s2282_s27 + $0x10] sm:$0xff]  ;;  %v427_v29 = vld [vmem:[%s2282_s27 + $0x8] sm:$0xff] }
  0x80   : > { %1541 = vmatpush.msra.mxu2 %v437_v9  ;;  %462 = vmatpush.msra.mxu0 %v437_v9  ;;  %v445_v26 = vld [vmem:[%s2282_s27 + $0x98] sm:$0xff]  ;;  %v444_v28 = vld [vmem:[%s2282_s27 + $0x90] sm:$0xff]  ;;  %v443_v30 = vld [vmem:[%s2282_s27 + $0x88] sm:$0xff] }
  0x81   : > { %1557 = vmatpush.msra.mxu3 %v453_v10  ;;  %575 = vmatpush.msra.mxu1 %v453_v10  ;;  %v426_v31 = vld [vmem:[%s2282_s27] sm:$0xff]  ;;  %v395_v34 = vld [vmem:[%s2274_s9 + $0x108] sm:$0xff]  ;;  %v396_v37 = vld [vmem:[%s2274_s9 + $0x110] sm:$0xff] }
  0x82   : > { %1542 = vmatpush.msra.mxu2 %v436_v11  ;;  %463 = vmatpush.msra.mxu0 %v436_v11  ;;  %v442_v32 = vld [vmem:[%s2282_s27 + $0x80] sm:$0xff]  ;;  %v363_v36 = vld [vmem:[%s2274_s9 + $0x8] sm:$0xff]  ;;  %v397_v38 = vld [vmem:[%s2274_s9 + $0x118] sm:$0xff] }
  0x83   : > { %1558 = vmatpush.msra.mxu3 %v452_v12  ;;  %576 = vmatpush.msra.mxu1 %v452_v12  ;;  %v394_v33 = vld [vmem:[%s2274_s9 + $0x100] sm:$0xff]  ;;  %v364_v39 = vld [vmem:[%s2274_s9 + $0x10] sm:$0xff]  ;;  %v365_v40 = vld [vmem:[%s2274_s9 + $0x18] sm:$0xff] }
  0x84   : > { %1543 = vmatpush.msra.mxu2 %v435_v13  ;;  %464 = vmatpush.msra.mxu0 %v435_v13  ;;  %v362_v35 = vld [vmem:[%s2274_s9] sm:$0xff]  ;;  %v399_v42 = vld [vmem:[%s2274_s9 + $0x128] sm:$0xff]  ;;  %v400_v45 = vld [vmem:[%s2274_s9 + $0x130] sm:$0xff] }
  0x85   : > { %1559 = vmatpush.msra.mxu3 %v451_v14  ;;  %577 = vmatpush.msra.mxu1 %v451_v14  ;;  %v398_v41 = vld [vmem:[%s2274_s9 + $0x120] sm:$0xff]  ;;  %v367_v44 = vld [vmem:[%s2274_s9 + $0x28] sm:$0xff]  ;;  %v401_v46 = vld [vmem:[%s2274_s9 + $0x138] sm:$0xff] }
  0x86   : > { %1544 = vmatpush.msra.mxu2 %v434_v15  ;;  %465 = vmatpush.msra.mxu0 %v434_v15  ;;  %v366_v43 = vld [vmem:[%s2274_s9 + $0x20] sm:$0xff]  ;;  %v368_v47 = vld [vmem:[%s2274_s9 + $0x30] sm:$0xff]  ;;  %v369_v48 = vld [vmem:[%s2274_s9 + $0x38] sm:$0xff] }
  0x87   : > { %1560 = vmatpush.msra.mxu3 %v450_v16  ;;  %578 = vmatpush.msra.mxu1 %v450_v16  ;;  %v402_v49 = vld [vmem:[%s2274_s9 + $0x140] sm:$0xff]  ;;  %v403_v50 = vld [vmem:[%s2274_s9 + $0x148] sm:$0xff]  ;;  %v404_v53 = vld [vmem:[%s2274_s9 + $0x150] sm:$0xff] }
  0x88   : > { %1545 = vmatpush.msra.mxu2 %v433_v17  ;;  %466 = vmatpush.msra.mxu0 %v433_v17  ;;  %v370_v51 = vld [vmem:[%s2274_s9 + $0x40] sm:$0xff]  ;;  %v371_v52 = vld [vmem:[%s2274_s9 + $0x48] sm:$0xff]  ;;  %v405_v54 = vld [vmem:[%s2274_s9 + $0x158] sm:$0xff] }
  0x89   : > { %1561 = vmatpush.msra.mxu3 %v449_v18  ;;  %579 = vmatpush.msra.mxu1 %v449_v18  ;;  %v372_v55 = vld [vmem:[%s2274_s9 + $0x50] sm:$0xff]  ;;  %v373_v56 = vld [vmem:[%s2274_s9 + $0x58] sm:$0xff]  ;;  %v406_v57 = vld [vmem:[%s2274_s9 + $0x160] sm:$0xff] }
  0x8a   : > { %1546 = vmatpush.msra.mxu2 %v432_v19  ;;  %467 = vmatpush.msra.mxu0 %v432_v19  ;;  %v407_v58 = vld [vmem:[%s2274_s9 + $0x168] sm:$0xff]  ;;  %v374_v59 = vld [vmem:[%s2274_s9 + $0x60] sm:$0xff]  ;;  %v408_v61 = vld [vmem:[%s2274_s9 + $0x170] sm:$0xff] }
  0x8b   : > { %1562 = vmatpush.msra.mxu3 %v448_v20  ;;  %580 = vmatpush.msra.mxu1 %v448_v20  ;;  %v375_v60 = vld [vmem:[%s2274_s9 + $0x68] sm:$0xff]  ;;  %v409_v62 = vld [vmem:[%s2274_s9 + $0x178] sm:$0xff]  ;;  %v376_v63 = vld [vmem:[%s2274_s9 + $0x70] sm:$0xff] }
  0x8c   : > { %1547 = vmatpush.msra.mxu2 %v431_v21  ;;  %468 = vmatpush.msra.mxu0 %v431_v21  ;;  %v377_v0 = vld [vmem:[%s2274_s9 + $0x78] sm:$0xff]  ;;  %v410_v1 = vld [vmem:[%s2274_s9 + $0x180] sm:$0xff]  ;;  %v411_v2 = vld [vmem:[%s2274_s9 + $0x188] sm:$0xff] }
  0x8d   : > { %1563 = vmatpush.msra.mxu3 %v447_v22  ;;  %581 = vmatpush.msra.mxu1 %v447_v22  ;;  %v378_v3 = vld [vmem:[%s2274_s9 + $0x80] sm:$0xff]  ;;  %v379_v4 = vld [vmem:[%s2274_s9 + $0x88] sm:$0xff]  ;;  %v412_v5 = vld [vmem:[%s2274_s9 + $0x190] sm:$0xff] }
  0x8e   : > { %1548 = vmatpush.msra.mxu2 %v430_v23  ;;  %469 = vmatpush.msra.mxu0 %v430_v23  ;;  %v413_v6 = vld [vmem:[%s2274_s9 + $0x198] sm:$0xff]  ;;  %v380_v7 = vld [vmem:[%s2274_s9 + $0x90] sm:$0xff]  ;;  %v414_v9 = vld [vmem:[%s2274_s9 + $0x1a0] sm:$0xff] }
  0x8f   : > { %1564 = vmatpush.msra.mxu3 %v446_v24  ;;  %582 = vmatpush.msra.mxu1 %v446_v24  ;;  %v381_v8 = vld [vmem:[%s2274_s9 + $0x98] sm:$0xff]  ;;  %v415_v10 = vld [vmem:[%s2274_s9 + $0x1a8] sm:$0xff]  ;;  %v382_v11 = vld [vmem:[%s2274_s9 + $0xa0] sm:$0xff] }
  0x90   : > { %1549 = vmatpush.msra.mxu2 %v429_v25  ;;  %470 = vmatpush.msra.mxu0 %v429_v25  ;;  %v383_v12 = vld [vmem:[%s2274_s9 + $0xa8] sm:$0xff]  ;;  %v416_v13 = vld [vmem:[%s2274_s9 + $0x1b0] sm:$0xff]  ;;  %v417_v14 = vld [vmem:[%s2274_s9 + $0x1b8] sm:$0xff] }
  0x91   : > { %1565 = vmatpush.msra.mxu3 %v445_v26  ;;  %583 = vmatpush.msra.mxu1 %v445_v26  ;;  %v384_v15 = vld [vmem:[%s2274_s9 + $0xb0] sm:$0xff]  ;;  %v385_v16 = vld [vmem:[%s2274_s9 + $0xb8] sm:$0xff]  ;;  %v418_v17 = vld [vmem:[%s2274_s9 + $0x1c0] sm:$0xff] }
  0x92   : > { %1550 = vmatpush.msra.mxu2 %v428_v27  ;;  %471 = vmatpush.msra.mxu0 %v428_v27  ;;  %v419_v18 = vld [vmem:[%s2274_s9 + $0x1c8] sm:$0xff]  ;;  %v386_v19 = vld [vmem:[%s2274_s9 + $0xc0] sm:$0xff]  ;;  %v420_v21 = vld [vmem:[%s2274_s9 + $0x1d0] sm:$0xff] }
  0x93   : > { %1566 = vmatpush.msra.mxu3 %v444_v28  ;;  %584 = vmatpush.msra.mxu1 %v444_v28  ;;  %v387_v20 = vld [vmem:[%s2274_s9 + $0xc8] sm:$0xff]  ;;  %v421_v22 = vld [vmem:[%s2274_s9 + $0x1d8] sm:$0xff]  ;;  %v388_v23 = vld [vmem:[%s2274_s9 + $0xd0] sm:$0xff] }
  0x94   : > { %1551 = vmatpush.msra.mxu2 %v427_v29  ;;  %472 = vmatpush.msra.mxu0 %v427_v29  ;;  %v389_v24 = vld [vmem:[%s2274_s9 + $0xd8] sm:$0xff]  ;;  %v422_v25 = vld [vmem:[%s2274_s9 + $0x1e0] sm:$0xff]  ;;  %v423_v26 = vld [vmem:[%s2274_s9 + $0x1e8] sm:$0xff] }
  0x95   : > { %1567 = vmatpush.msra.mxu3 %v443_v30  ;;  %585 = vmatpush.msra.mxu1 %v443_v30  ;;  %v390_v27 = vld [vmem:[%s2274_s9 + $0xe0] sm:$0xff]  ;;  %v391_v28 = vld [vmem:[%s2274_s9 + $0xe8] sm:$0xff]  ;;  %v424_v29 = vld [vmem:[%s2274_s9 + $0x1f0] sm:$0xff] }
  0x96   : > { %1552 = vmatpush.msra.mxu2 %v426_v31  ;;  %473 = vmatpush.msra.mxu0 %v426_v31  ;;  %v425_v30 = vld [vmem:[%s2274_s9 + $0x1f8] sm:$0xff]  ;;  %v392_v31 = vld [vmem:[%s2274_s9 + $0xf0] sm:$0xff] }
  0x97   : > { %1568 = vmatpush.msra.mxu3 %v442_v32  ;;  %522 = vmatmul.f32.vlgmr.msra.gmra.mxu2 %v394_v33 }
  0x98   : > { %635 = vmatmul.f32.vlgmr.msra.gmra.mxu3 %v395_v34  ;;  %586 = vmatpush.msra.mxu1 %v442_v32  ;;  %v393_v32 = vld [vmem:[%s2274_s9 + $0xf8] sm:$0xff]  ;;  %v330_v34 = vld [vmem:[#allocation2 + $0xb0] sm:$0xff] }
  0x99   : > { %474 = vmatmul.f32.vlgmr.msra.gmra.mxu0 %v362_v35  ;;  %587 = vmatmul.f32.vlgmr.msra.gmra.mxu1 %v363_v36 }
  0x9f   : > { %525 = vmatmul.f32.gmra.mxu2 %v396_v37 }
  0xa0   : > { %638 = vmatmul.f32.gmra.mxu3 %v397_v38 }
  0xa1   : > { %477 = vmatmul.f32.gmra.mxu0 %v364_v39  ;;  %590 = vmatmul.f32.gmra.mxu1 %v365_v40  ;;  %v346_v39 = vld [vmem:[#allocation2 + $0x38] sm:$0xff] }
  0xa7   : > { %528 = vmatmul.f32.gmra.mxu2 %v398_v41 }
  0xa8   : > { %641 = vmatmul.f32.gmra.mxu3 %v399_v42 }
  0xa9   : > { %480 = vmatmul.f32.gmra.mxu0 %v366_v43  ;;  %593 = vmatmul.f32.gmra.mxu1 %v367_v44  ;;  %v331_v44 = vld [vmem:[#allocation2] sm:$0xff] }
  0xaf   : > { %531 = vmatmul.f32.gmra.mxu2 %v400_v45 }
  0xb0   : > { %644 = vmatmul.f32.gmra.mxu3 %v401_v46 }
  0xb1   : > { %483 = vmatmul.f32.gmra.mxu0 %v368_v47  ;;  %596 = vmatmul.f32.gmra.mxu1 %v369_v48 }
  0xb7   : > { %534 = vmatmul.f32.gmra.mxu2 %v402_v49  ;;  %v347_v49 = vld [vmem:[#allocation2 + $0x58] sm:$0xff] }
  0xb8   : > { %647 = vmatmul.f32.gmra.mxu3 %v403_v50 }
  0xb9   : > { %486 = vmatmul.f32.gmra.mxu0 %v370_v51  ;;  %599 = vmatmul.f32.gmra.mxu1 %v371_v52 }
  0xbf   : > { %537 = vmatmul.f32.gmra.mxu2 %v404_v53 }
  0xc0   : > { %650 = vmatmul.f32.gmra.mxu3 %v405_v54  ;;  %v332_v54 = vld [vmem:[#allocation2 + $0xd8] sm:$0xff] }
  0xc1   : > { %489 = vmatmul.f32.gmra.mxu0 %v372_v55  ;;  %602 = vmatmul.f32.gmra.mxu1 %v373_v56 }
  0xc7   : > { %540 = vmatmul.f32.gmra.mxu2 %v406_v57 }
  0xc8   : > { %653 = vmatmul.f32.gmra.mxu3 %v407_v58 }
  0xc9   : > { %492 = vmatmul.f32.gmra.mxu0 %v374_v59  ;;  %605 = vmatmul.f32.gmra.mxu1 %v375_v60  ;;  %v348_v59 = vld [vmem:[#allocation2 + $0x40] sm:$0xff] }
  0xcf   : > { %543 = vmatmul.f32.gmra.mxu2 %v408_v61 }
  0xd0   : > { %656 = vmatmul.f32.gmra.mxu3 %v409_v62 }
  0xd1   : > { %495 = vmatmul.f32.gmra.mxu0 %v376_v63  ;;  %608 = vmatmul.f32.gmra.mxu1 %v377_v0  ;;  %v333_v0 = vld [vmem:[#allocation2 + $0x18] sm:$0xff] }
  0xd7   : > { %546 = vmatmul.f32.gmra.mxu2 %v410_v1 }
  0xd8   : > { %659 = vmatmul.f32.gmra.mxu3 %v411_v2 }
  0xd9   : > { %498 = vmatmul.f32.gmra.mxu0 %v378_v3  ;;  %611 = vmatmul.f32.gmra.mxu1 %v379_v4 }
  0xdf   : > { %549 = vmatmul.f32.gmra.mxu2 %v412_v5  ;;  %v349_v5 = vld [vmem:[#allocation2 + $0xc8] sm:$0xff] }
  0xe0   : > { %662 = vmatmul.f32.gmra.mxu3 %v413_v6 }
  0xe1   : > { %501 = vmatmul.f32.gmra.mxu0 %v380_v7  ;;  %614 = vmatmul.f32.gmra.mxu1 %v381_v8 }
  0xe7   : > { %552 = vmatmul.f32.gmra.mxu2 %v414_v9 }
  0xe8   : > { %665 = vmatmul.f32.gmra.mxu3 %v415_v10  ;;  %v334_v10 = vld [vmem:[#allocation2 + $0x50] sm:$0xff] }
  0xe9   : > { %504 = vmatmul.f32.gmra.mxu0 %v382_v11  ;;  %617 = vmatmul.f32.gmra.mxu1 %v383_v12 }
  0xef   : > { %555 = vmatmul.f32.gmra.mxu2 %v416_v13 }
  0xf0   : > { %668 = vmatmul.f32.gmra.mxu3 %v417_v14 }
  0xf1   : > { %507 = vmatmul.f32.gmra.mxu0 %v384_v15  ;;  %620 = vmatmul.f32.gmra.mxu1 %v385_v16  ;;  %v350_v15 = vld [vmem:[#allocation2 + $0xe0] sm:$0xff] }
  0xf7   : > { %558 = vmatmul.f32.gmra.mxu2 %v418_v17 }
  0xf8   : > { %671 = vmatmul.f32.gmra.mxu3 %v419_v18 }
  0xf9   : > { %510 = vmatmul.f32.gmra.mxu0 %v386_v19  ;;  %623 = vmatmul.f32.gmra.mxu1 %v387_v20  ;;  %v335_v20 = vld [vmem:[#allocation2 + $0x68] sm:$0xff] }
  0xff   : > { %561 = vmatmul.f32.gmra.mxu2 %v420_v21 }
 0x100   : > { %674 = vmatmul.f32.gmra.mxu3 %v421_v22 }
 0x101   : > { %513 = vmatmul.f32.gmra.mxu0 %v388_v23  ;;  %626 = vmatmul.f32.gmra.mxu1 %v389_v24 }
 0x107   : > { %564 = vmatmul.f32.gmra.mxu2 %v422_v25  ;;  %v351_v25 = vld [vmem:[#allocation2 + $0x90] sm:$0xff] }
 0x108   : > { %677 = vmatmul.f32.gmra.mxu3 %v423_v26 }
 0x109   : > { %516 = vmatmul.f32.gmra.mxu0 %v390_v27  ;;  %629 = vmatmul.f32.gmra.mxu1 %v391_v28 }
 0x10f   : > { %567 = vmatmul.f32.gmra.mxu2 %v424_v29 }
 0x110   : > { %680 = vmatmul.f32.gmra.mxu3 %v425_v30  ;;  %v336_v30 = vld [vmem:[#allocation2 + $0x30] sm:$0xff] }
 0x111   : > { %519 = vmatmul.f32.gmra.mxu0 %v392_v31  ;;  %632 = vmatmul.f32.gmra.mxu1 %v393_v32 }
 0x116   : > { %v475_v33 = vpop.f32.mrf.mxu0  ;;  %v588_v35 = vpop.f32.mrf.mxu1 }
 0x117   : > { %v589_v36 = vadd.f32 %v588_v35, %v475_v33  ;;  %v352_v35 = vld [vmem:[#allocation2 + $0x70] sm:$0xff] }
 0x119   : > { %v684_v37 = vadd.f32 %v589_v36, %v330_v34 }
 0x11a   : > { %v523_v38 = vpop.f32.mrf.mxu2 }
 0x11b   : > { %v636_v40 = vpop.f32.mrf.mxu3  ;;  %716 = vst [vmem:[#allocation2 + $0xb0] sm:$0xff] %v684_v37 }
 0x11c   : > { %v637_v41 = vadd.f32 %v636_v40, %v523_v38  ;;  %v337_v40 = vld [vmem:[#allocation2 + $0x48] sm:$0xff] }
 0x11e   : > { %v700_v42 = vadd.f32 %v637_v41, %v346_v39  ;;  %v478_v43 = vpop.f32.mrf.mxu0  ;;  %v591_v45 = vpop.f32.mrf.mxu1 }
 0x11f   : > { %v592_v46 = vadd.f32 %v591_v45, %v478_v43  ;;  %v353_v45 = vld [vmem:[#allocation2 + $0xc0] sm:$0xff] }
 0x120   : > { %732 = vst [vmem:[#allocation2 + $0x38] sm:$0xff] %v700_v42 }
 0x121   : > { %v685_v47 = vadd.f32 %v592_v46, %v331_v44 }
 0x122   : > { %v526_v48 = vpop.f32.mrf.mxu2 }
 0x123   : > { %v639_v50 = vpop.f32.mrf.mxu3  ;;  %717 = vst [vmem:[#allocation2] sm:$0xff] %v685_v47 }
 0x124   : > { %v640_v51 = vadd.f32 %v639_v50, %v526_v48  ;;  %v338_v50 = vld [vmem:[#allocation2 + $0x80] sm:$0xff] }
 0x126   : > { %v701_v52 = vadd.f32 %v640_v51, %v347_v49  ;;  %v481_v53 = vpop.f32.mrf.mxu0  ;;  %v594_v55 = vpop.f32.mrf.mxu1 }
 0x127   : > { %v595_v56 = vadd.f32 %v594_v55, %v481_v53  ;;  %v354_v55 = vld [vmem:[#allocation2 + $0xa8] sm:$0xff] }
 0x128   : > { %733 = vst [vmem:[#allocation2 + $0x58] sm:$0xff] %v701_v52 }
 0x129   : > { %v686_v57 = vadd.f32 %v595_v56, %v332_v54 }
 0x12a   : > { %v529_v58 = vpop.f32.mrf.mxu2 }
 0x12b   : > { %v642_v60 = vpop.f32.mrf.mxu3  ;;  %718 = vst [vmem:[#allocation2 + $0xd8] sm:$0xff] %v686_v57 }
 0x12c   : > { %v643_v61 = vadd.f32 %v642_v60, %v529_v58  ;;  %v339_v60 = vld [vmem:[#allocation2 + $0x88] sm:$0xff] }
 0x12e   : > { %v702_v62 = vadd.f32 %v643_v61, %v348_v59  ;;  %v484_v63 = vpop.f32.mrf.mxu0  ;;  %v597_v1 = vpop.f32.mrf.mxu1 }
 0x12f   : > { %v598_v2 = vadd.f32 %v597_v1, %v484_v63  ;;  %v355_v1 = vld [vmem:[#allocation2 + $0xd0] sm:$0xff] }
 0x130   : > { %734 = vst [vmem:[#allocation2 + $0x40] sm:$0xff] %v702_v62 }
 0x131   : > { %v687_v3 = vadd.f32 %v598_v2, %v333_v0 }
 0x132   : > { %v532_v4 = vpop.f32.mrf.mxu2 }
 0x133   : > { %v645_v6 = vpop.f32.mrf.mxu3  ;;  %719 = vst [vmem:[#allocation2 + $0x18] sm:$0xff] %v687_v3 }
 0x134   : > { %v646_v7 = vadd.f32 %v645_v6, %v532_v4  ;;  %v340_v6 = vld [vmem:[#allocation2 + $0xe8] sm:$0xff] }
 0x136   : > { %v703_v8 = vadd.f32 %v646_v7, %v349_v5  ;;  %v487_v9 = vpop.f32.mrf.mxu0  ;;  %v600_v11 = vpop.f32.mrf.mxu1 }
 0x137   : > { %v601_v12 = vadd.f32 %v600_v11, %v487_v9  ;;  %v356_v11 = vld [vmem:[#allocation2 + $0x10] sm:$0xff] }
 0x138   : > { %735 = vst [vmem:[#allocation2 + $0xc8] sm:$0xff] %v703_v8 }
 0x139   : > { %v688_v13 = vadd.f32 %v601_v12, %v334_v10 }
 0x13a   : > { %v535_v14 = vpop.f32.mrf.mxu2 }
 0x13b   : > { %v648_v16 = vpop.f32.mrf.mxu3  ;;  %720 = vst [vmem:[#allocation2 + $0x50] sm:$0xff] %v688_v13 }
 0x13c   : > { %v649_v17 = vadd.f32 %v648_v16, %v535_v14  ;;  %v341_v16 = vld [vmem:[#allocation2 + $0xb8] sm:$0xff] }
 0x13e   : > { %v704_v18 = vadd.f32 %v649_v17, %v350_v15  ;;  %v490_v19 = vpop.f32.mrf.mxu0  ;;  %v603_v21 = vpop.f32.mrf.mxu1 }
 0x13f   : > { %v604_v22 = vadd.f32 %v603_v21, %v490_v19  ;;  %v357_v21 = vld [vmem:[#allocation2 + $0x28] sm:$0xff] }
 0x140   : > { %736 = vst [vmem:[#allocation2 + $0xe0] sm:$0xff] %v704_v18 }
 0x141   : > { %v689_v23 = vadd.f32 %v604_v22, %v335_v20 }
 0x142   : > { %v538_v24 = vpop.f32.mrf.mxu2 }
 0x143   : > { %v651_v26 = vpop.f32.mrf.mxu3  ;;  %721 = vst [vmem:[#allocation2 + $0x68] sm:$0xff] %v689_v23 }
 0x144   : > { %v652_v27 = vadd.f32 %v651_v26, %v538_v24  ;;  %v342_v26 = vld [vmem:[#allocation2 + $0x60] sm:$0xff] }
 0x146   : > { %v705_v28 = vadd.f32 %v652_v27, %v351_v25  ;;  %v493_v29 = vpop.f32.mrf.mxu0  ;;  %v606_v31 = vpop.f32.mrf.mxu1 }
 0x147   : > { %v607_v32 = vadd.f32 %v606_v31, %v493_v29  ;;  %v358_v31 = vld [vmem:[#allocation2 + $0xa0] sm:$0xff] }
 0x148   : > { %737 = vst [vmem:[#allocation2 + $0x90] sm:$0xff] %v705_v28 }
 0x149   : > { %v690_v33 = vadd.f32 %v607_v32, %v336_v30 }
 0x14a   : > { %v541_v34 = vpop.f32.mrf.mxu2 }
 0x14b   : > { %v654_v36 = vpop.f32.mrf.mxu3  ;;  %722 = vst [vmem:[#allocation2 + $0x30] sm:$0xff] %v690_v33 }
 0x14c   : > { %v655_v37 = vadd.f32 %v654_v36, %v541_v34  ;;  %v343_v36 = vld [vmem:[#allocation2 + $0xf0] sm:$0xff] }
 0x14e   : > { %v706_v38 = vadd.f32 %v655_v37, %v352_v35  ;;  %v496_v39 = vpop.f32.mrf.mxu0  ;;  %v609_v41 = vpop.f32.mrf.mxu1 }
 0x14f   : > { %v610_v42 = vadd.f32 %v609_v41, %v496_v39  ;;  %v359_v41 = vld [vmem:[#allocation2 + $0xf8] sm:$0xff] }
 0x150   : > { %738 = vst [vmem:[#allocation2 + $0x70] sm:$0xff] %v706_v38 }
 0x151   : > { %v691_v43 = vadd.f32 %v610_v42, %v337_v40 }
 0x152   : > { %v544_v44 = vpop.f32.mrf.mxu2 }
 0x153   : > { %v657_v46 = vpop.f32.mrf.mxu3  ;;  %723 = vst [vmem:[#allocation2 + $0x48] sm:$0xff] %v691_v43 }
 0x154   : > { %v658_v47 = vadd.f32 %v657_v46, %v544_v44  ;;  %v344_v46 = vld [vmem:[#allocation2 + $0x8] sm:$0xff] }
 0x156   : > { %v707_v48 = vadd.f32 %v658_v47, %v353_v45  ;;  %v499_v49 = vpop.f32.mrf.mxu0  ;;  %v612_v51 = vpop.f32.mrf.mxu1 }
 0x157   : > { %v613_v52 = vadd.f32 %v612_v51, %v499_v49  ;;  %v360_v51 = vld [vmem:[#allocation2 + $0x20] sm:$0xff] }
 0x158   : > { %739 = vst [vmem:[#allocation2 + $0xc0] sm:$0xff] %v707_v48 }
 0x159   : > { %v692_v53 = vadd.f32 %v613_v52, %v338_v50 }
 0x15a   : > { %v547_v54 = vpop.f32.mrf.mxu2 }
 0x15b   : > { %v660_v56 = vpop.f32.mrf.mxu3  ;;  %724 = vst [vmem:[#allocation2 + $0x80] sm:$0xff] %v692_v53 }
 0x15c   : > { %v661_v57 = vadd.f32 %v660_v56, %v547_v54  ;;  %v345_v56 = vld [vmem:[#allocation2 + $0x78] sm:$0xff] }
 0x15e   : > { %v708_v58 = vadd.f32 %v661_v57, %v354_v55  ;;  %v502_v59 = vpop.f32.mrf.mxu0  ;;  %v615_v61 = vpop.f32.mrf.mxu1 }
 0x15f   : > { %v616_v62 = vadd.f32 %v615_v61, %v502_v59  ;;  %v361_v61 = vld [vmem:[#allocation2 + $0x98] sm:$0xff] }
 0x160   : > { %740 = vst [vmem:[#allocation2 + $0xa8] sm:$0xff] %v708_v58 }
 0x161   : > { %v693_v63 = vadd.f32 %v616_v62, %v339_v60 }
 0x162   : > { %v550_v0 = vpop.f32.mrf.mxu2 }
 0x163   : > { %v663_v2 = vpop.f32.mrf.mxu3  ;;  %725 = vst [vmem:[#allocation2 + $0x88] sm:$0xff] %v693_v63 }
 0x164   : > { %v664_v3 = vadd.f32 %v663_v2, %v550_v0 }
 0x166   : > { %v709_v4 = vadd.f32 %v664_v3, %v355_v1  ;;  %v505_v5 = vpop.f32.mrf.mxu0  ;;  %v618_v7 = vpop.f32.mrf.mxu1 }
 0x167   : > { %v619_v8 = vadd.f32 %v618_v7, %v505_v5 }
 0x168   : > { %741 = vst [vmem:[#allocation2 + $0xd0] sm:$0xff] %v709_v4 }
 0x169   : > { %v694_v9 = vadd.f32 %v619_v8, %v340_v6 }
 0x16a   : > { %v553_v10 = vpop.f32.mrf.mxu2 }
 0x16b   : > { %v666_v12 = vpop.f32.mrf.mxu3  ;;  %726 = vst [vmem:[#allocation2 + $0xe8] sm:$0xff] %v694_v9 }
 0x16c   : > { %v667_v13 = vadd.f32 %v666_v12, %v553_v10 }
 0x16e   : > { %v710_v14 = vadd.f32 %v667_v13, %v356_v11  ;;  %v508_v15 = vpop.f32.mrf.mxu0  ;;  %v621_v17 = vpop.f32.mrf.mxu1 }
 0x16f   : > { %v622_v18 = vadd.f32 %v621_v17, %v508_v15 }
 0x170   : > { %742 = vst [vmem:[#allocation2 + $0x10] sm:$0xff] %v710_v14 }
 0x171   : > { %v695_v19 = vadd.f32 %v622_v18, %v341_v16 }
 0x172   : > { %v556_v20 = vpop.f32.mrf.mxu2 }
 0x173   : > { %v669_v22 = vpop.f32.mrf.mxu3  ;;  %727 = vst [vmem:[#allocation2 + $0xb8] sm:$0xff] %v695_v19 }
 0x174   : > { %v670_v23 = vadd.f32 %v669_v22, %v556_v20 }
 0x176   : > { %v711_v24 = vadd.f32 %v670_v23, %v357_v21  ;;  %v511_v25 = vpop.f32.mrf.mxu0  ;;  %v624_v27 = vpop.f32.mrf.mxu1 }
 0x177   : > { %v625_v28 = vadd.f32 %v624_v27, %v511_v25 }
 0x178   : > { %743 = vst [vmem:[#allocation2 + $0x28] sm:$0xff] %v711_v24 }
 0x179   : > { %v696_v29 = vadd.f32 %v625_v28, %v342_v26 }
 0x17a   : > { %v559_v30 = vpop.f32.mrf.mxu2 }
 0x17b   : > { %v672_v32 = vpop.f32.mrf.mxu3  ;;  %728 = vst [vmem:[#allocation2 + $0x60] sm:$0xff] %v696_v29 }
 0x17c   : > { %v673_v33 = vadd.f32 %v672_v32, %v559_v30 }
 0x17e   : > { %v712_v34 = vadd.f32 %v673_v33, %v358_v31  ;;  %v514_v35 = vpop.f32.mrf.mxu0  ;;  %v627_v37 = vpop.f32.mrf.mxu1 }
 0x17f   : > { %v628_v38 = vadd.f32 %v627_v37, %v514_v35 }
 0x180   : > { %744 = vst [vmem:[#allocation2 + $0xa0] sm:$0xff] %v712_v34 }
 0x181   : > { %v697_v39 = vadd.f32 %v628_v38, %v343_v36 }
 0x182   : > { %v562_v40 = vpop.f32.mrf.mxu2 }
 0x183   : > { %v675_v42 = vpop.f32.mrf.mxu3  ;;  %729 = vst [vmem:[#allocation2 + $0xf0] sm:$0xff] %v697_v39 }
 0x184   : > { %v676_v43 = vadd.f32 %v675_v42, %v562_v40 }
 0x186   : > { %v713_v44 = vadd.f32 %v676_v43, %v359_v41  ;;  %v517_v45 = vpop.f32.mrf.mxu0  ;;  %v630_v47 = vpop.f32.mrf.mxu1 }
 0x187   : > { %v631_v48 = vadd.f32 %v630_v47, %v517_v45 }
 0x188   : > { %745 = vst [vmem:[#allocation2 + $0xf8] sm:$0xff] %v713_v44 }
 0x189   : > { %v698_v49 = vadd.f32 %v631_v48, %v344_v46 }
 0x18a   : > { %v565_v50 = vpop.f32.mrf.mxu2 }
 0x18b   : > { %v678_v52 = vpop.f32.mrf.mxu3  ;;  %730 = vst [vmem:[#allocation2 + $0x8] sm:$0xff] %v698_v49 }
 0x18c   : > { %v679_v53 = vadd.f32 %v678_v52, %v565_v50 }
 0x18e   : > { %v714_v54 = vadd.f32 %v679_v53, %v360_v51  ;;  %v520_v55 = vpop.f32.mrf.mxu0  ;;  %v633_v57 = vpop.f32.mrf.mxu1 }
 0x18f   : > { %v634_v58 = vadd.f32 %v633_v57, %v520_v55 }
 0x190   : > { %746 = vst [vmem:[#allocation2 + $0x20] sm:$0xff] %v714_v54 }
 0x191   : > { %v699_v59 = vadd.f32 %v634_v58, %v345_v56 }
 0x192   : > { %v568_v60 = vpop.f32.mrf.mxu2 }
 0x193   : > { %v681_v62 = vpop.f32.mrf.mxu3  ;;  %731 = vst [vmem:[#allocation2 + $0x78] sm:$0xff] %v699_v59 }
 0x194   : > { %v682_v63 = vadd.f32 %v681_v62, %v568_v60  ;;  %751 = sbr.rel (%p1527_p8) target bundleno = 643 (0x283), region = 52 }
 0x196   : > { %v715_v0 = vadd.f32 %v682_v63, %v361_v61 }
 0x198   : > { %747 = vst [vmem:[#allocation2 + $0x98] sm:$0xff] %v715_v0 }
 0x199   : > { %v2397_v1 = vld [vmem:[#allocation2 + $0x50] sm:$0xff]  ;;  %v2399_v2 = vld [vmem:[#allocation2 + $0xd8] sm:$0xff]  ;;  %v2409_v7 = vld [vmem:[#allocation2 + $0x68] sm:$0xff] }
 0x19a   : > { %v2401_v3 = vld [vmem:[#allocation2 + $0xb0] sm:$0xff]  ;;  %v788_v4 = vmul.f32 %v2397_v1, %v2397_v1  ;;  %v786_v5 = vmul.f32 %v2399_v2, %v2399_v2  ;;  %v2411_v8 = vld [vmem:[#allocation2 + $0x18] sm:$0xff]  ;;  %v2413_v9 = vld [vmem:[#allocation2] sm:$0xff]  ;;  %v789_v10 = vmul.f32 %v2409_v7, %v2409_v7 }
 0x19b   : > { %v784_v6 = vmul.f32 %v2401_v3, %v2401_v3  ;;  %v787_v11 = vmul.f32 %v2411_v8, %v2411_v8  ;;  %v785_v12 = vmul.f32 %v2413_v9, %v2413_v9  ;;  %v2421_v13 = vld [vmem:[#allocation2 + $0x80] sm:$0xff]  ;;  %v2423_v14 = vld [vmem:[#allocation2 + $0x48] sm:$0xff]  ;;  %v2425_v15 = vld [vmem:[#allocation2 + $0x30] sm:$0xff] }
 0x19c   : > { %824 = vadd.xlane.f32.xlu2 %v788_v4  ;;  %820 = vadd.xlane.f32.xlu1 %v786_v5  ;;  %v792_v16 = vmul.f32 %v2421_v13, %v2421_v13  ;;  %v791_v17 = vmul.f32 %v2423_v14, %v2423_v14  ;;  %v790_v18 = vmul.f32 %v2425_v15, %v2425_v15  ;;  %v2433_v19 = vld [vmem:[#allocation2 + $0xb8] sm:$0xff]  ;;  %v2435_v20 = vld [vmem:[#allocation2 + $0xe8] sm:$0xff]  ;;  %v2447_v26 = vld [vmem:[#allocation2 + $0xf0] sm:$0xff] }
 0x19d   : > { %816 = vadd.xlane.f32.xlu0 %v784_v6  ;;  %v2437_v21 = vld [vmem:[#allocation2 + $0x88] sm:$0xff]  ;;  %v795_v22 = vmul.f32 %v2433_v19, %v2433_v19  ;;  %v794_v23 = vmul.f32 %v2435_v20, %v2435_v20  ;;  %v2449_v27 = vld [vmem:[#allocation2 + $0x60] sm:$0xff]  ;;  %v797_v29 = vmul.f32 %v2447_v26, %v2447_v26  ;;  %v2457_v31 = vld [vmem:[#allocation2 + $0x58] sm:$0xff] }
 0x19e   : > { %v793_v24 = vmul.f32 %v2437_v21, %v2437_v21  ;;  %v2445_v25 = vld [vmem:[#allocation2 + $0x8] sm:$0xff]  ;;  %v796_v30 = vmul.f32 %v2449_v27, %v2449_v27  ;;  %v2459_v32 = vld [vmem:[#allocation2 + $0x38] sm:$0xff]  ;;  %v801_v34 = vmul.f32 %v2457_v31, %v2457_v31  ;;  %v2469_v37 = vld [vmem:[#allocation2 + $0xe0] sm:$0xff] }
 0x19f   : > { %v798_v28 = vmul.f32 %v2445_v25, %v2445_v25  ;;  %v2461_v33 = vld [vmem:[#allocation2 + $0x78] sm:$0xff]  ;;  %v800_v35 = vmul.f32 %v2459_v32, %v2459_v32  ;;  %v2471_v38 = vld [vmem:[#allocation2 + $0xc8] sm:$0xff]  ;;  %v2473_v39 = vld [vmem:[#allocation2 + $0x40] sm:$0xff]  ;;  %v804_v40 = vmul.f32 %v2469_v37, %v2469_v37 }
 0x1a0   : > { %v799_v36 = vmul.f32 %v2461_v33, %v2461_v33  ;;  %v803_v41 = vmul.f32 %v2471_v38, %v2471_v38  ;;  %v802_v42 = vmul.f32 %v2473_v39, %v2473_v39  ;;  %v2481_v43 = vld [vmem:[#allocation2 + $0xc0] sm:$0xff]  ;;  %v2483_v44 = vld [vmem:[#allocation2 + $0x70] sm:$0xff]  ;;  %v776_v51 = vld [vmem:[#allocation2 + $0xa8] sm:$0xff] }
 0x1a1   : > { %v2485_v45 = vld [vmem:[#allocation2 + $0x90] sm:$0xff]  ;;  %v807_v46 = vmul.f32 %v2481_v43, %v2481_v43  ;;  %v806_v47 = vmul.f32 %v2483_v44, %v2483_v44  ;;  %v808_v54 = vmul.f32 %v776_v51, %v776_v51  ;;  %v781_v55 = vld [vmem:[#allocation2 + $0xf8] sm:$0xff]  ;;  %v780_v56 = vld [vmem:[#allocation2 + $0xa0] sm:$0xff] }
 0x1a2   : > { %v805_v48 = vmul.f32 %v2485_v45, %v2485_v45  ;;  %v2493_v49 = vld [vmem:[#allocation2 + $0x10] sm:$0xff]  ;;  %v779_v57 = vld [vmem:[#allocation2 + $0x28] sm:$0xff]  ;;  %v813_v58 = vmul.f32 %v781_v55, %v781_v55  ;;  %v812_v59 = vmul.f32 %v780_v56, %v780_v56  ;;  %v783_v61 = vld [vmem:[#allocation2 + $0x98] sm:$0xff] }
 0x1a3   : > { %v2495_v50 = vld [vmem:[#allocation2 + $0xd0] sm:$0xff]  ;;  %v810_v52 = vmul.f32 %v2493_v49, %v2493_v49  ;;  %v811_v60 = vmul.f32 %v779_v57, %v779_v57  ;;  %v782_v62 = vld [vmem:[#allocation2 + $0x20] sm:$0xff]  ;;  %v815_v63 = vmul.f32 %v783_v61, %v783_v61 }
 0x1a4   : > { %826 = vadd.xlane.f32.xlu2 %v789_v10  ;;  %822 = vadd.xlane.f32.xlu1 %v787_v11  ;;  %v809_v53 = vmul.f32 %v2495_v50, %v2495_v50  ;;  %v814_v0 = vmul.f32 %v782_v62, %v782_v62 }
 0x1a5   : > { %818 = vadd.xlane.f32.xlu0 %v785_v12 }
 0x1ac   : > { %832 = vadd.xlane.f32.xlu2 %v792_v16  ;;  %830 = vadd.xlane.f32.xlu1 %v791_v17 }
 0x1ad   : > { %828 = vadd.xlane.f32.xlu0 %v790_v18 }
 0x1b4   : > { %838 = vadd.xlane.f32.xlu2 %v795_v22  ;;  %836 = vadd.xlane.f32.xlu1 %v794_v23 }
 0x1b5   : > { %834 = vadd.xlane.f32.xlu0 %v793_v24 }
 0x1bc   : > { %844 = vadd.xlane.f32.xlu2 %v798_v28  ;;  %842 = vadd.xlane.f32.xlu1 %v797_v29 }
 0x1bd   : > { %840 = vadd.xlane.f32.xlu0 %v796_v30 }
 0x1c4   : > { %850 = vadd.xlane.f32.xlu2 %v801_v34  ;;  %848 = vadd.xlane.f32.xlu1 %v800_v35 }
 0x1c5   : > { %846 = vadd.xlane.f32.xlu0 %v799_v36 }
 0x1cc   : > { %856 = vadd.xlane.f32.xlu2 %v804_v40  ;;  %854 = vadd.xlane.f32.xlu1 %v803_v41 }
 0x1cd   : > { %852 = vadd.xlane.f32.xlu0 %v802_v42 }
 0x1d4   : > { %862 = vadd.xlane.f32.xlu2 %v807_v46  ;;  %860 = vadd.xlane.f32.xlu1 %v806_v47 }
 0x1d5   : > { %858 = vadd.xlane.f32.xlu0 %v805_v48 }
 0x1dc   : > { %868 = vadd.xlane.f32.xlu2 %v810_v52  ;;  %866 = vadd.xlane.f32.xlu1 %v809_v53 }
 0x1dd   : > { %864 = vadd.xlane.f32.xlu0 %v808_v54 }
 0x1e4   : > { %874 = vadd.xlane.f32.xlu2 %v813_v58  ;;  %872 = vadd.xlane.f32.xlu1 %v812_v59 }
 0x1e5   : > { %870 = vadd.xlane.f32.xlu0 %v811_v60 }
 0x1ec   : > { %878 = vadd.xlane.f32.xlu1 %v815_v63 }
 0x1ed   : > { %876 = vadd.xlane.f32.xlu0 %v814_v0 }
 0x20f   : > { %v825_v4 = vpop.xlane.xlu2 %824  ;;  %v821_v5 = vpop.xlane.xlu1 %820 }
 0x210   : > { %v884_v6 = vmax.f32 %v825_v4, 1e-24  ;;  %v882_v10 = vmax.f32 %v821_v5, 1e-24  ;;  %v817_v11 = vpop.xlane.xlu0 %816  ;;  %v1268_v5 = vld [vmem:[%s2291_s7 + $0x20] sm:$0xff] }
 0x211   : > { %v880_v12 = vmax.f32 %v817_v11, 1e-24 }
 0x212   : > { %1713 = vrsqrt.f32 %v884_v6  ;;  %vm958_vm0 = vweird.f32 %v884_v6  ;;  %vm938_vm1 = vweird.f32 %v882_v10 }
 0x213   : > { %1715 = vrsqrt.f32 %v882_v10  ;;  %vm918_vm3 = vweird.f32 %v880_v12 }
 0x214   : > { %1717 = vrsqrt.f32 %v880_v12 }
 0x217   : > { %v827_v16 = vpop.xlane.xlu2 %826  ;;  %v823_v17 = vpop.xlane.xlu1 %822 }
 0x218   : > { %v1714_v18 = vpop.eup %1713  ;;  %v2501_v22 = vmax.f32 %v827_v16, 1e-24  ;;  %v2503_v23 = vmax.f32 %v823_v17, 1e-24  ;;  %v819_v24 = vpop.xlane.xlu0 %818 }
 0x219   : > { %v1716_v28 = vpop.eup %1715  ;;  %v953_v29 = vmul.f32 %v1714_v18, %v884_v6  ;;  %v2505_v30 = vmax.f32 %v819_v24, 1e-24  ;;  %vm959_vm2 = vweird.f32 %v1714_v18 }
 0x21a   : > { %v1718_v34 = vpop.eup %1717  ;;  %v933_v35 = vmul.f32 %v1716_v28, %v882_v10  ;;  %1719 = vrsqrt.f32 %v2501_v22  ;;  %vm939_vm4 = vweird.f32 %v1716_v28  ;;  %vm968_vm5 = vweird.f32 %v2501_v22  ;;  %vm960_vm7 = vmor %vm958_vm0, %vm959_vm2 }
 0x21b   : > { %v954_v36 = vmul.f32 %v1714_v18, %v953_v29  ;;  %v913_v40 = vmul.f32 %v1718_v34, %v880_v12  ;;  %1721 = vrsqrt.f32 %v2503_v23  ;;  %vm919_vm6 = vweird.f32 %v1718_v34  ;;  %vm940_vm8 = vmor %vm938_vm1, %vm939_vm4  ;;  %v1266_v29 = vld [vmem:[%s2291_s7 + $0x10] sm:$0xff] }
 0x21c   : > { %v934_v41 = vmul.f32 %v1716_v28, %v933_v35  ;;  %1723 = vrsqrt.f32 %v2505_v30  ;;  %vm920_vm9 = vmor %vm918_vm3, %vm919_vm6  ;;  %vm948_vm10 = vweird.f32 %v2503_v23  ;;  %vm928_vm15 = vweird.f32 %v2505_v30 }
 0x21d   : > { %v955_v42 = vmul.f32 0.5, %v954_v36  ;;  %v914_v46 = vmul.f32 %v1718_v34, %v913_v40 }
 0x21e   : > { %v935_v47 = vmul.f32 0.5, %v934_v41 }
 0x21f   : > { %v956_v48 = vsub.f32 1.5, %v955_v42  ;;  %v915_v51 = vmul.f32 0.5, %v914_v46  ;;  %v833_v52 = vpop.xlane.xlu2 %832  ;;  %v831_v53 = vpop.xlane.xlu1 %830 }
 0x220   : > { %v2510_v54 = vpop.eup %1719  ;;  %v936_v55 = vsub.f32 1.5, %v935_v47  ;;  %v2513_v56 = vmax.f32 %v833_v52, 1e-24  ;;  %v829_v57 = vpop.xlane.xlu0 %828  ;;  %v2526_v4 = vmax.f32 %v831_v53, 1e-24 }
 0x221   : > { %v2515_v58 = vpop.eup %1721  ;;  %v957_v59 = vmul.f32 %v1714_v18, %v956_v48  ;;  %v916_v60 = vsub.f32 1.5, %v915_v51  ;;  %v963_v61 = vmul.f32 %v2510_v54, %v2501_v22  ;;  %vm969_vm11 = vweird.f32 %v2510_v54 }
 0x222   : > { %v2519_v62 = vpop.eup %1723  ;;  %v937_v63 = vmul.f32 %v1716_v28, %v936_v55  ;;  %v943_v0 = vmul.f32 %v2515_v58, %v2503_v23  ;;  %1725 = vrsqrt.f32 %v2513_v56  ;;  %vm949_vm12 = vweird.f32 %v2515_v58  ;;  %vm970_vm14 = vmor %vm968_vm5, %vm969_vm11 }
 0x223   : > { %v961_v11 = vsel %vm960_vm7, %v1714_v18, %v957_v59  ;;  %v917_v16 = vmul.f32 %v1718_v34, %v916_v60  ;;  %v964_v17 = vmul.f32 %v2510_v54, %v963_v61  ;;  %v923_v6 = vmul.f32 %v2519_v62, %v2505_v30  ;;  %v1264_v18 = vld [vmem:[%s2291_s7] sm:$0xff]  ;;  %vm950_vm0 = vmor %vm948_vm10, %vm949_vm12 }
 0x224   : > { %v1236_v24 = vmul.f32 %v961_v11, %v2397_v1  ;;  %v941_v35 = vsel %vm940_vm8, %v1716_v28, %v937_v63  ;;  %v944_v36 = vmul.f32 %v2515_v58, %v943_v0  ;;  %1727 = vrsqrt.f32 %v2526_v4  ;;  %v1269_v0 = vld [vmem:[%s2291_s7 + $0x28] sm:$0xff] }
 0x225   : > { %v1234_v10 = vmul.f32 %v941_v35, %v2399_v2  ;;  %v921_v40 = vsel %vm920_vm9, %v1718_v34, %v917_v16  ;;  %v965_v41 = vmul.f32 0.5, %v964_v17  ;;  %v924_v42 = vmul.f32 %v2519_v62, %v923_v6  ;;  %v1267_v17 = vld [vmem:[%s2291_s7 + $0x18] sm:$0xff] }
 0x226   : > { %v1300_v46 = vadd.f32 %v1268_v5, %v1236_v24  ;;  %v1232_v1 = vmul.f32 %v921_v40, %v2401_v3  ;;  %v945_v12 = vmul.f32 0.5, %v944_v36  ;;  %v2550_v3 = vmax.f32 %v829_v57, 1e-24  ;;  %v1265_v24 = vld [vmem:[%s2291_s7 + $0x8] sm:$0xff] }
 0x227   : > { %v1298_v28 = vadd.f32 %v1266_v29, %v1234_v10  ;;  %v966_v47 = vsub.f32 1.5, %v965_v41  ;;  %v925_v48 = vmul.f32 0.5, %v924_v42  ;;  %v839_v2 = vpop.xlane.xlu2 %838  ;;  %v837_v51 = vpop.xlane.xlu1 %836  ;;  %vm929_vm13 = vweird.f32 %v2519_v62 }
 0x228   : > { %v2546_v52 = vpop.eup %1725  ;;  %1332 = vst [vmem:[%s2297_s26 + $0x20] sm:$0xff] %v1300_v46  ;;  %v1296_v34 = vadd.f32 %v1264_v18, %v1232_v1  ;;  %v946_v53 = vsub.f32 1.5, %v945_v12  ;;  %v835_v55 = vpop.xlane.xlu0 %834  ;;  %1729 = vrsqrt.f32 %v2550_v3  ;;  %v2565_v63 = vmax.f32 %v839_v2, 1e-24  ;;  %vm930_vm1 = vmor %vm928_vm15, %vm929_vm13 }
 0x229   : > { %1330 = vst [vmem:[%s2297_s26 + $0x10] sm:$0xff] %v1298_v28  ;;  %v967_v59 = vmul.f32 %v2510_v54, %v966_v47  ;;  %v926_v60 = vsub.f32 1.5, %v925_v48  ;;  %v993_v61 = vmul.f32 %v2546_v52, %v2513_v56  ;;  %v2575_v16 = vmax.f32 %v837_v51, 1e-24 }
 0x22a   : > { %1328 = vst [vmem:[%s2297_s26] sm:$0xff] %v1296_v34  ;;  %v947_v57 = vmul.f32 %v2515_v58, %v946_v53  ;;  %1731 = vrsqrt.f32 %v2565_v63  ;;  %vm998_vm2 = vweird.f32 %v2513_v56  ;;  %vm999_vm3 = vweird.f32 %v2546_v52  ;;  %v1272_v34 = vld [vmem:[%s2291_s7 + $0x40] sm:$0xff] }
 0x22b   : > { %v971_v5 = vsel %vm970_vm14, %v2510_v54, %v967_v59  ;;  %v927_v22 = vmul.f32 %v2519_v62, %v926_v60  ;;  %v994_v11 = vmul.f32 %v2546_v52, %v993_v61  ;;  %v2583_v54 = vpop.eup %1727  ;;  %1733 = vrsqrt.f32 %v2575_v16  ;;  %vm1000_vm4 = vmor %vm998_vm2, %vm999_vm3 }
 0x22c   : > { %v1237_v30 = vmul.f32 %v971_v5, %v2409_v7  ;;  %v951_v6 = vsel %vm950_vm0, %v2515_v58, %v947_v57  ;;  %v983_v36 = vmul.f32 %v2583_v54, %v2526_v4  ;;  %vm988_vm5 = vweird.f32 %v2526_v4 }
 0x22d   : > { %v1235_v23 = vmul.f32 %v951_v6, %v2411_v8  ;;  %v931_v29 = vsel %vm930_vm1, %v2519_v62, %v927_v22  ;;  %v995_v35 = vmul.f32 0.5, %v994_v11  ;;  %v2594_v8 = vmax.f32 %v835_v55, 1e-24 }
 0x22e   : > { %v1301_v7 = vadd.f32 %v1269_v0, %v1237_v30  ;;  %v1233_v58 = vmul.f32 %v931_v29, %v2413_v9  ;;  %v2596_v41 = vpop.eup %1729  ;;  %v984_v9 = vmul.f32 %v2583_v54, %v983_v36  ;;  %vm978_vm6 = vweird.f32 %v2550_v3 }
 0x22f   : > { %v1299_v10 = vadd.f32 %v1267_v17, %v1235_v23  ;;  %v996_v18 = vsub.f32 1.5, %v995_v35  ;;  %v845_v62 = vpop.xlane.xlu2 %844  ;;  %v843_v40 = vpop.xlane.xlu1 %842  ;;  %v973_v28 = vmul.f32 %v2596_v41, %v2550_v3  ;;  %1735 = vrsqrt.f32 %v2594_v8  ;;  %v1271_v35 = vld [vmem:[%s2291_s7 + $0x38] sm:$0xff] }
 0x230   : > { %1333 = vst [vmem:[%s2297_s26 + $0x28] sm:$0xff] %v1301_v7  ;;  %v1297_v42 = vadd.f32 %v1265_v24, %v1233_v58  ;;  %v2600_v46 = vmax.f32 %v845_v62, 1e-24  ;;  %v841_v1 = vpop.xlane.xlu0 %840  ;;  %v2607_v47 = vmax.f32 %v843_v40, 1e-24  ;;  %v2609_v48 = vpop.eup %1731  ;;  %v985_v2 = vmul.f32 0.5, %v984_v9 }
 0x231   : > { %1331 = vst [vmem:[%s2297_s26 + $0x18] sm:$0xff] %v1299_v10  ;;  %v997_v12 = vmul.f32 %v2546_v52, %v996_v18  ;;  %v2619_v51 = vpop.eup %1733  ;;  %v974_v55 = vmul.f32 %v2596_v41, %v973_v28  ;;  %v1023_v59 = vmul.f32 %v2609_v48, %v2565_v63  ;;  %vm1028_vm7 = vweird.f32 %v2565_v63 }
 0x232   : > { %1329 = vst [vmem:[%s2297_s26 + $0x8] sm:$0xff] %v1297_v42  ;;  %1737 = vrsqrt.f32 %v2600_v46  ;;  %v986_v60 = vsub.f32 1.5, %v985_v2  ;;  %vm989_vm8 = vweird.f32 %v2583_v54  ;;  %v1013_v61 = vmul.f32 %v2619_v51, %v2575_v16 }
 0x233   : > { %v1001_v53 = vsel %vm1000_vm4, %v2546_v52, %v997_v12  ;;  %v975_v57 = vmul.f32 0.5, %v974_v55  ;;  %v1024_v0 = vmul.f32 %v2609_v48, %v1023_v59  ;;  %vm1018_vm9 = vweird.f32 %v2575_v16  ;;  %vm2642_vm10 = vmor %vm988_vm5, %vm989_vm8 }
 0x234   : > { %v1240_v56 = vmul.f32 %v1001_v53, %v2421_v13  ;;  %1739 = vrsqrt.f32 %v2607_v47  ;;  %v987_v5 = vmul.f32 %v2583_v54, %v986_v60  ;;  %v1014_v13 = vmul.f32 %v2619_v51, %v1013_v61  ;;  %v1274_v60 = vld [vmem:[%s2291_s7 + $0x50] sm:$0xff] }
 0x235   : > { %v2636_v22 = vmax.f32 %v841_v1, 1e-24  ;;  %v2638_v11 = vpop.eup %1735  ;;  %v976_v17 = vsub.f32 1.5, %v975_v57  ;;  %vm979_vm11 = vweird.f32 %v2596_v41  ;;  %v1025_v6 = vmul.f32 0.5, %v1024_v0  ;;  %v1270_v1 = vld [vmem:[%s2291_s7 + $0x30] sm:$0xff] }
 0x236   : > { %v1304_v52 = vadd.f32 %v1272_v34, %v1240_v56  ;;  %vm1058_vm12 = vweird.f32 %v2600_v46  ;;  %v991_v4 = vsel %vm2642_vm10, %v2583_v54, %v987_v5  ;;  %vm1029_vm13 = vweird.f32 %v2609_v48  ;;  %vm980_vm15 = vmor %vm978_vm6, %vm979_vm11 }
 0x237   : > { %v851_v23 = vpop.xlane.xlu2 %850  ;;  %v849_v24 = vpop.xlane.xlu1 %848  ;;  %v1015_v7 = vmul.f32 0.5, %v1014_v13  ;;  %v1003_v58 = vmul.f32 %v2638_v11, %v2594_v8  ;;  %vm1008_vm14 = vweird.f32 %v2594_v8  ;;  %v1239_v10 = vmul.f32 %v991_v4, %v2423_v14  ;;  %vm1030_vm1 = vmor %vm1028_vm7, %vm1029_vm13 }
 0x238   : > { %v2648_v29 = vpop.eup %1737  ;;  %1336 = vst [vmem:[%s2297_s26 + $0x40] sm:$0xff] %v1304_v52  ;;  %v847_v36 = vpop.xlane.xlu0 %846  ;;  %v977_v18 = vmul.f32 %v2596_v41, %v976_v17  ;;  %v1026_v62 = vsub.f32 1.5, %v1025_v6  ;;  %vm1019_vm0 = vweird.f32 %v2619_v51  ;;  %1741 = vrsqrt.f32 %v2636_v22 }
 0x239   : > { %v1053_v40 = vmul.f32 %v2648_v29, %v2600_v46  ;;  %v1016_v54 = vsub.f32 1.5, %v1015_v7  ;;  %v1004_v42 = vmul.f32 %v2638_v11, %v1003_v58  ;;  %v1303_v9 = vadd.f32 %v1271_v35, %v1239_v10  ;;  %vm1020_vm2 = vmor %vm1018_vm9, %vm1019_vm0  ;;  %v1273_v58 = vld [vmem:[%s2291_s7 + $0x48] sm:$0xff] }
 0x23a   : > { %v2670_v14 = vpop.eup %1739  ;;  %v981_v12 = vsel %vm980_vm15, %v2596_v41, %v977_v18  ;;  %v1027_v28 = vmul.f32 %v2609_v48, %v1026_v62  ;;  %v1275_v41 = vld [vmem:[%s2291_s7 + $0x58] sm:$0xff]  ;;  %vm1009_vm3 = vweird.f32 %v2638_v11  ;;  %vm1059_vm4 = vweird.f32 %v2648_v29 }
 0x23b   : > { %v1054_v3 = vmul.f32 %v2648_v29, %v1053_v40  ;;  %v1238_v2 = vmul.f32 %v981_v12, %v2425_v15  ;;  %v1017_v34 = vmul.f32 %v2619_v51, %v1016_v54  ;;  %v1005_v53 = vmul.f32 0.5, %v1004_v42  ;;  %1335 = vst [vmem:[%s2297_s26 + $0x38] sm:$0xff] %v1303_v9  ;;  %vm1010_vm5 = vmor %vm1008_vm14, %vm1009_vm3 }
 0x23c   : > { %v1043_v55 = vmul.f32 %v2670_v14, %v2607_v47  ;;  %v1031_v59 = vsel %vm1030_vm1, %v2609_v48, %v1027_v28  ;;  %v2698_v16 = vmax.f32 %v851_v23, 1e-24  ;;  %vm1060_vm6 = vmor %vm1058_vm12, %vm1059_vm4  ;;  %vm1049_vm7 = vweird.f32 %v2670_v14 }
 0x23d   : > { %v1055_v15 = vmul.f32 0.5, %v1054_v3  ;;  %v1302_v63 = vadd.f32 %v1270_v1, %v1238_v2  ;;  %v1243_v56 = vmul.f32 %v1031_v59, %v2433_v19  ;;  %v1021_v61 = vsel %vm1020_vm2, %v2619_v51, %v1017_v34 }
 0x23e   : > { %v1006_v57 = vsub.f32 1.5, %v1005_v53  ;;  %v1242_v48 = vmul.f32 %v1021_v61, %v2435_v20  ;;  %v1044_v52 = vmul.f32 %v2670_v14, %v1043_v55  ;;  %v2700_v30 = vpop.eup %1741  ;;  %v2704_v51 = vmax.f32 %v849_v24, 1e-24 }
 0x23f   : > { %v1056_v0 = vsub.f32 1.5, %v1055_v15  ;;  %v857_v5 = vpop.xlane.xlu2 %856  ;;  %v855_v13 = vpop.xlane.xlu1 %854  ;;  %1334 = vst [vmem:[%s2297_s26 + $0x30] sm:$0xff] %v1302_v63  ;;  %v1307_v17 = vadd.f32 %v1275_v41, %v1243_v56  ;;  %v2706_v20 = vmax.f32 %v847_v36, 1e-24  ;;  %v1033_v7 = vmul.f32 %v2700_v30, %v2636_v22  ;;  %v1278_v36 = vld [vmem:[%s2291_s7 + $0x70] sm:$0xff]  ;;  %v1276_v15 = vld [vmem:[%s2291_s7 + $0x60] sm:$0xff] }
 0x240   : > { %v1007_v19 = vmul.f32 %v2638_v11, %v1006_v57  ;;  %v853_v6 = vpop.xlane.xlu0 %852  ;;  %v1306_v35 = vadd.f32 %v1274_v60, %v1242_v48  ;;  %v1045_v4 = vmul.f32 0.5, %v1044_v52  ;;  %1743 = vrsqrt.f32 %v2698_v16 }
 0x241   : > { %v1057_v23 = vmul.f32 %v2648_v29, %v1056_v0  ;;  %1339 = vst [vmem:[%s2297_s26 + $0x58] sm:$0xff] %v1307_v17  ;;  %vm1048_vm8 = vweird.f32 %v2607_v47  ;;  %1745 = vrsqrt.f32 %v2704_v51  ;;  %v2738_v42 = vmax.f32 %v855_v13, 1e-24  ;;  %v1277_v47 = vld [vmem:[%s2291_s7 + $0x68] sm:$0xff] }
 0x242   : > { %v1011_v24 = vsel %vm1010_vm5, %v2638_v11, %v1007_v19  ;;  %1338 = vst [vmem:[%s2297_s26 + $0x50] sm:$0xff] %v1306_v35  ;;  %v1046_v18 = vsub.f32 1.5, %v1045_v4  ;;  %v1034_v11 = vmul.f32 %v2700_v30, %v1033_v7  ;;  %1747 = vrsqrt.f32 %v2706_v20  ;;  %vm1050_vm9 = vmor %vm1048_vm8, %vm1049_vm7 }
 0x243   : > { %v1241_v8 = vmul.f32 %v1011_v24, %v2437_v21  ;;  %v1061_v10 = vsel %vm1060_vm6, %v2648_v29, %v1057_v23  ;;  %v2736_v29 = vmax.f32 %v857_v5, 1e-24  ;;  %vm1039_vm10 = vweird.f32 %v2700_v30 }
 0x244   : > { %v1246_v62 = vmul.f32 %v1061_v10, %v2445_v25  ;;  %v1047_v40 = vmul.f32 %v2670_v14, %v1046_v18  ;;  %v1035_v54 = vmul.f32 0.5, %v1034_v11  ;;  %v2740_v25 = vmax.f32 %v853_v6, 1e-24 }
 0x245   : > { %v1305_v46 = vadd.f32 %v1273_v58, %v1241_v8  ;;  %1749 = vrsqrt.f32 %v2736_v29  ;;  %vm1038_vm11 = vweird.f32 %v2636_v22  ;;  %vm1088_vm13 = vweird.f32 %v2698_v16 }
 0x246   : > { %v1310_v21 = vadd.f32 %v1278_v36, %v1246_v62  ;;  %v1051_v9 = vsel %vm1050_vm9, %v2670_v14, %v1047_v40  ;;  %v1036_v1 = vsub.f32 1.5, %v1035_v54  ;;  %v2746_v3 = vpop.eup %1743  ;;  %1751 = vrsqrt.f32 %v2738_v42  ;;  %vm1040_vm12 = vmor %vm1038_vm11, %vm1039_vm10 }
 0x247   : > { %1337 = vst [vmem:[%s2297_s26 + $0x48] sm:$0xff] %v1305_v46  ;;  %v863_v12 = vpop.xlane.xlu2 %862  ;;  %v861_v28 = vpop.xlane.xlu1 %860  ;;  %v1245_v2 = vmul.f32 %v1051_v9, %v2447_v26  ;;  %v1083_v14 = vmul.f32 %v2746_v3, %v2698_v16  ;;  %1753 = vrsqrt.f32 %v2740_v25  ;;  %vm1078_vm14 = vweird.f32 %v2704_v51  ;;  %v1281_v46 = vld [vmem:[%s2291_s7 + $0x88] sm:$0xff] }
 0x248   : > { %1342 = vst [vmem:[%s2297_s26 + $0x70] sm:$0xff] %v1310_v21  ;;  %v859_v34 = vpop.xlane.xlu0 %858  ;;  %v1037_v53 = vmul.f32 %v2700_v30, %v1036_v1  ;;  %v2756_v55 = vpop.eup %1745  ;;  %v2760_v26 = vmax.f32 %v863_v12, 1e-24  ;;  %vm1068_vm15 = vweird.f32 %v2706_v20  ;;  %vm1118_vm0 = vweird.f32 %v2736_v29 }
 0x249   : > { %v1309_v41 = vadd.f32 %v1277_v47, %v1245_v2  ;;  %v2762_v59 = vpop.eup %1747  ;;  %v1084_v63 = vmul.f32 %v2746_v3, %v1083_v14  ;;  %v1073_v56 = vmul.f32 %v2756_v55, %v2704_v51  ;;  %v2778_v0 = vmax.f32 %v861_v28, 1e-24 }
 0x24a   : > { %v1041_v22 = vsel %vm1040_vm12, %v2700_v30, %v1037_v53  ;;  %v1063_v61 = vmul.f32 %v2762_v59, %v2706_v20  ;;  %1755 = vrsqrt.f32 %v2760_v26  ;;  %vm1089_vm1 = vweird.f32 %v2746_v3 }
 0x24b   : > { %1341 = vst [vmem:[%s2297_s26 + $0x68] sm:$0xff] %v1309_v41  ;;  %v1244_v60 = vmul.f32 %v1041_v22, %v2449_v27  ;;  %v1085_v57 = vmul.f32 0.5, %v1084_v63  ;;  %v1074_v48 = vmul.f32 %v2756_v55, %v1073_v56  ;;  %v2780_v52 = vpop.eup %1749  ;;  %vm1079_vm2 = vweird.f32 %v2756_v55  ;;  %vm1090_vm6 = vmor %vm1088_vm13, %vm1089_vm1  ;;  %v1279_v41 = vld [vmem:[%s2291_s7 + $0x78] sm:$0xff] }
 0x24c   : > { %v1064_v27 = vmul.f32 %v2762_v59, %v1063_v61  ;;  %v2785_v13 = vpop.eup %1751  ;;  %vm1069_vm3 = vweird.f32 %v2762_v59  ;;  %v1113_v19 = vmul.f32 %v2780_v52, %v2736_v29  ;;  %vm1108_vm4 = vweird.f32 %v2738_v42  ;;  %vm1080_vm9 = vmor %vm1078_vm14, %vm1079_vm2 }
 0x24d   : > { %v1308_v5 = vadd.f32 %v1276_v15, %v1244_v60  ;;  %v1086_v30 = vsub.f32 1.5, %v1085_v57  ;;  %v1075_v17 = vmul.f32 0.5, %v1074_v48  ;;  %v2792_v35 = vpop.eup %1753  ;;  %v1103_v4 = vmul.f32 %v2785_v13, %v2738_v42  ;;  %vm1070_vm10 = vmor %vm1068_vm15, %vm1069_vm3  ;;  %v1284_v48 = vld [vmem:[%s2291_s7 + $0xa0] sm:$0xff] }
 0x24e   : > { %v1065_v23 = vmul.f32 0.5, %v1064_v27  ;;  %1757 = vrsqrt.f32 %v2778_v0  ;;  %v2799_v7 = vmax.f32 %v859_v34, 1e-24  ;;  %v1114_v36 = vmul.f32 %v2780_v52, %v1113_v19 }
 0x24f   : > { %v2790_v6 = vpop.xlane.xlu1 %866  ;;  %1340 = vst [vmem:[%s2297_s26 + $0x60] sm:$0xff] %v1308_v5  ;;  %v1087_v24 = vmul.f32 %v2746_v3, %v1086_v30  ;;  %v1076_v8 = vsub.f32 1.5, %v1075_v17  ;;  %v1093_v10 = vmul.f32 %v2792_v35, %v2740_v25  ;;  %vm1098_vm5 = vweird.f32 %v2740_v25  ;;  %v869_v9 = vpop.xlane.xlu2 %868  ;;  %v1283_v17 = vld [vmem:[%s2291_s7 + $0x98] sm:$0xff] }
 0x250   : > { %v2801_v58 = vpop.xlane.xlu0 %864  ;;  %v2808_v18 = vpop.eup %1755  ;;  %v1066_v11 = vsub.f32 1.5, %v1065_v23  ;;  %vm1119_vm7 = vweird.f32 %v2780_v52  ;;  %v1104_v62 = vmul.f32 %v2785_v13, %v1103_v4  ;;  %vm1109_vm8 = vweird.f32 %v2785_v13  ;;  %v1282_v23 = vld [vmem:[%s2291_s7 + $0x90] sm:$0xff] }
 0x251   : > { %v1091_v40 = vsel %vm1090_vm6, %v2746_v3, %v1087_v24  ;;  %v1077_v54 = vmul.f32 %v2756_v55, %v1076_v8  ;;  %v1115_v21 = vmul.f32 0.5, %v1114_v36  ;;  %v1094_v47 = vmul.f32 %v2792_v35, %v1093_v10  ;;  %v1280_v3 = vld [vmem:[%s2291_s7 + $0x80] sm:$0xff]  ;;  %vm1120_vm12 = vmor %vm1118_vm0, %vm1119_vm7 }
 0x252   : > { %v1249_v16 = vmul.f32 %v1091_v40, %v2457_v31  ;;  %v1067_v1 = vmul.f32 %v2762_v59, %v1066_v11  ;;  %v1105_v12 = vmul.f32 0.5, %v1104_v62  ;;  %v1143_v28 = vmul.f32 %v2808_v18, %v2760_v26  ;;  %vm1110_vm14 = vmor %vm1108_vm4, %vm1109_vm8 }
 0x253   : > { %v1081_v2 = vsel %vm1080_vm9, %v2756_v55, %v1077_v54  ;;  %v1116_v31 = vsub.f32 1.5, %v1115_v21  ;;  %v1095_v34 = vmul.f32 0.5, %v1094_v47  ;;  %vm1099_vm11 = vweird.f32 %v2792_v35 }
 0x254   : > { %v2836_v51 = vpop.eup %1757  ;;  %v1313_v53 = vadd.f32 %v1281_v46, %v1249_v16  ;;  %v1248_v14 = vmul.f32 %v1081_v2, %v2459_v32  ;;  %v1071_v15 = vsel %vm1070_vm10, %v2762_v59, %v1067_v1  ;;  %v1106_v55 = vsub.f32 1.5, %v1105_v12  ;;  %vm1100_vm15 = vmor %vm1098_vm5, %vm1099_vm11  ;;  %v1287_v46 = vld [vmem:[%s2291_s7 + $0xb8] sm:$0xff]  ;;  %v1286_v1 = vld [vmem:[%s2291_s7 + $0xb0] sm:$0xff] }
 0x255   : > { %v1247_v22 = vmul.f32 %v1071_v15, %v2461_v33  ;;  %v1117_v20 = vmul.f32 %v2780_v52, %v1116_v31  ;;  %v1096_v63 = vsub.f32 1.5, %v1095_v34  ;;  %v1144_v56 = vmul.f32 %v2808_v18, %v1143_v28 }
 0x256   : > { %1345 = vst [vmem:[%s2297_s26 + $0x88] sm:$0xff] %v1313_v53  ;;  %v1312_v61 = vadd.f32 %v1280_v3, %v1248_v14  ;;  %v1107_v32 = vmul.f32 %v2785_v13, %v1106_v55  ;;  %vm1148_vm13 = vweird.f32 %v2760_v26  ;;  %v1133_v33 = vmul.f32 %v2836_v51, %v2778_v0 }
 0x257   : > { %v873_v60 = vpop.xlane.xlu1 %872  ;;  %v1311_v57 = vadd.f32 %v1279_v41, %v1247_v22  ;;  %v1121_v5 = vsel %vm1120_vm12, %v2780_v52, %v1117_v20  ;;  %v1097_v29 = vmul.f32 %v2792_v35, %v1096_v63  ;;  %v1145_v27 = vmul.f32 0.5, %v1144_v56  ;;  %v875_v11 = vpop.xlane.xlu2 %874 }
 0x258   : > { %v871_v59 = vpop.xlane.xlu0 %870  ;;  %1344 = vst [vmem:[%s2297_s26 + $0x80] sm:$0xff] %v1312_v61  ;;  %v1252_v30 = vmul.f32 %v1121_v5, %v2469_v37  ;;  %v1111_v19 = vsel %vm1110_vm14, %v2785_v13, %v1107_v32  ;;  %v1134_v52 = vmul.f32 %v2836_v51, %v1133_v33  ;;  %1759 = vrsqrt.f32 %v2799_v7  ;;  %v1285_v5 = vld [vmem:[%s2291_s7 + $0xa8] sm:$0xff] }
 0x259   : > { %1343 = vst [vmem:[%s2297_s26 + $0x78] sm:$0xff] %v1311_v57  ;;  %v1251_v42 = vmul.f32 %v1111_v19, %v2471_v38  ;;  %v1101_v4 = vsel %vm1100_vm15, %v2792_v35, %v1097_v29  ;;  %v1146_v37 = vsub.f32 1.5, %v1145_v27  ;;  %vm1149_vm0 = vweird.f32 %v2808_v18 }
 0x25a   : > { %v1316_v13 = vadd.f32 %v1284_v48, %v1252_v30  ;;  %v1250_v25 = vmul.f32 %v1101_v4, %v2473_v39  ;;  %v1135_v24 = vmul.f32 0.5, %v1134_v52  ;;  %v2876_v8 = vmax.f32 %v869_v9, 1e-24  ;;  %vm1150_vm1 = vmor %vm1148_vm13, %vm1149_vm0 }
 0x25b   : > { %v1315_v36 = vadd.f32 %v1283_v17, %v1251_v42  ;;  %v1147_v10 = vmul.f32 %v2808_v18, %v1146_v37  ;;  %v2880_v38 = vmax.f32 %v2790_v6, 1e-24  ;;  %v2883_v35 = vmax.f32 %v2801_v58, 1e-24 }
 0x25c   : > { %1348 = vst [vmem:[%s2297_s26 + $0xa0] sm:$0xff] %v1316_v13  ;;  %v1314_v62 = vadd.f32 %v1282_v23, %v1250_v25  ;;  %v1136_v39 = vsub.f32 1.5, %v1135_v24  ;;  %vm1139_vm2 = vweird.f32 %v2836_v51  ;;  %1761 = vrsqrt.f32 %v2876_v8 }
 0x25d   : > { %1347 = vst [vmem:[%s2297_s26 + $0x98] sm:$0xff] %v1315_v36  ;;  %v1151_v40 = vsel %vm1150_vm1, %v2808_v18, %v1147_v10  ;;  %vm1138_vm3 = vweird.f32 %v2778_v0  ;;  %1763 = vrsqrt.f32 %v2880_v38  ;;  %v2901_v54 = vmax.f32 %v875_v11, 1e-24  ;;  %v1290_v11 = vld [vmem:[%s2291_s7 + $0xd0] sm:$0xff] }
 0x25e   : > { %v2895_v6 = vpop.eup %1759  ;;  %1346 = vst [vmem:[%s2297_s26 + $0x90] sm:$0xff] %v1314_v62  ;;  %v1255_v26 = vmul.f32 %v1151_v40, %v2481_v43  ;;  %v1137_v58 = vmul.f32 %v2836_v51, %v1136_v39  ;;  %1765 = vrsqrt.f32 %v2883_v35  ;;  %vm1140_vm4 = vmor %vm1138_vm3, %vm1139_vm2  ;;  %v2905_v21 = vmax.f32 %v873_v60, 1e-24 }
 0x25f   : > { %v1123_v18 = vmul.f32 %v2895_v6, %v2799_v7  ;;  %v2907_v0 = vmax.f32 %v871_v59, 1e-24  ;;  %v879_v47 = vpop.xlane.xlu1 %878  ;;  %1767 = vrsqrt.f32 %v2901_v54  ;;  %vm1128_vm5 = vweird.f32 %v2799_v7 }
 0x260   : > { %v877_v9 = vpop.xlane.xlu0 %876  ;;  %v1319_v16 = vadd.f32 %v1287_v46, %v1255_v26  ;;  %v1141_v43 = vsel %vm1140_vm4, %v2836_v51, %v1137_v58  ;;  %1769 = vrsqrt.f32 %v2905_v21  ;;  %v2920_v2 = vmax.f32 %v879_v47, 1e-24  ;;  %v1288_v47 = vld [vmem:[%s2291_s7 + $0xc0] sm:$0xff] }
 0x261   : > { %v1254_v12 = vmul.f32 %v1141_v43, %v2483_v44  ;;  %v1124_v28 = vmul.f32 %v2895_v6, %v1123_v18  ;;  %1771 = vrsqrt.f32 %v2907_v0  ;;  %v2922_v31 = vmax.f32 %v877_v9, 1e-24  ;;  %v1777_v43 = vld [vmem:[#allocation2 + $0xa8] sm:$0xff] }
 0x262   : > { %v2915_v3 = vpop.eup %1761  ;;  %1351 = vst [vmem:[%s2297_s26 + $0xb8] sm:$0xff] %v1319_v16  ;;  %vm1178_vm6 = vweird.f32 %v2876_v8  ;;  %vm1129_vm7 = vweird.f32 %v2895_v6  ;;  %vm1168_vm8 = vweird.f32 %v2880_v38  ;;  %1773 = vrsqrt.f32 %v2920_v2 }
 0x263   : > { %v2924_v34 = vpop.eup %1763  ;;  %v1318_v51 = vadd.f32 %v1286_v1, %v1254_v12  ;;  %v1125_v44 = vmul.f32 0.5, %v1124_v28  ;;  %v1173_v53 = vmul.f32 %v2915_v3, %v2876_v8  ;;  %vm1179_vm9 = vweird.f32 %v2915_v3  ;;  %vm1130_vm14 = vmor %vm1128_vm5, %vm1129_vm7 }
 0x264   : > { %v2929_v14 = vpop.eup %1765  ;;  %v1163_v41 = vmul.f32 %v2924_v34, %v2880_v38  ;;  %vm1158_vm10 = vweird.f32 %v2883_v35  ;;  %vm1208_vm11 = vweird.f32 %v2901_v54  ;;  %vm1169_vm12 = vweird.f32 %v2924_v34  ;;  %vm1180_vm3 = vmor %vm1178_vm6, %vm1179_vm9 }
 0x265   : > { %1350 = vst [vmem:[%s2297_s26 + $0xb0] sm:$0xff] %v1318_v51  ;;  %v1126_v15 = vsub.f32 1.5, %v1125_v44  ;;  %v1174_v55 = vmul.f32 %v2915_v3, %v1173_v53  ;;  %v1153_v22 = vmul.f32 %v2929_v14, %v2883_v35  ;;  %v2943_v20 = vpop.eup %1767  ;;  %vm1159_vm13 = vweird.f32 %v2929_v14  ;;  %vm1170_vm4 = vmor %vm1168_vm8, %vm1169_vm12  ;;  %v1778_v44 = vld [vmem:[#allocation2 + $0xf8] sm:$0xff] }
 0x266   : > { %v1164_v63 = vmul.f32 %v2924_v34, %v1163_v41  ;;  %1775 = vrsqrt.f32 %v2922_v31  ;;  %v2949_v56 = vpop.eup %1769  ;;  %v1203_v33 = vmul.f32 %v2943_v20, %v2901_v54  ;;  %vm1209_vm15 = vweird.f32 %v2943_v20  ;;  %vm1160_vm5 = vmor %vm1158_vm10, %vm1159_vm13 }
 0x267   : > { %v1127_v60 = vmul.f32 %v2895_v6, %v1126_v15  ;;  %v1175_v61 = vmul.f32 0.5, %v1174_v55  ;;  %v1154_v32 = vmul.f32 %v2929_v14, %v1153_v22  ;;  %v2955_v59 = vpop.eup %1771  ;;  %v1193_v48 = vmul.f32 %v2949_v56, %v2905_v21  ;;  %vm1210_vm6 = vmor %vm1208_vm11, %vm1209_vm15  ;;  %v1779_v55 = vld [vmem:[#allocation2 + $0xa0] sm:$0xff] }
 0x268   : > { %v1165_v57 = vmul.f32 0.5, %v1164_v63  ;;  %vm1198_vm0 = vweird.f32 %v2905_v21  ;;  %vm1199_vm1 = vweird.f32 %v2949_v56  ;;  %v1204_v17 = vmul.f32 %v2943_v20, %v1203_v33  ;;  %v2969_v7 = vpop.eup %1773  ;;  %v1291_v63 = vld [vmem:[%s2291_s7 + $0xd8] sm:$0xff] }
 0x269   : > { %v1131_v29 = vsel %vm1130_vm14, %v2895_v6, %v1127_v60  ;;  %v1176_v27 = vsub.f32 1.5, %v1175_v61  ;;  %v1155_v30 = vmul.f32 0.5, %v1154_v32  ;;  %v1194_v42 = vmul.f32 %v2949_v56, %v1193_v48  ;;  %v1289_v6 = vld [vmem:[%s2291_s7 + $0xc8] sm:$0xff]  ;;  %vm1200_vm7 = vmor %vm1198_vm0, %vm1199_vm1 }
 0x26a   : > { %v1253_v19 = vmul.f32 %v1131_v29, %v2485_v45  ;;  %v1166_v52 = vsub.f32 1.5, %v1165_v57  ;;  %v1183_v23 = vmul.f32 %v2955_v59, %v2907_v0  ;;  %v1205_v13 = vmul.f32 0.5, %v1204_v17  ;;  %v1780_v61 = vld [vmem:[#allocation2 + $0x28] sm:$0xff] }
 0x26b   : > { %v1177_v4 = vmul.f32 %v2915_v3, %v1176_v27  ;;  %v1156_v37 = vsub.f32 1.5, %v1155_v30  ;;  %vm1189_vm2 = vweird.f32 %v2955_v59  ;;  %v1195_v36 = vmul.f32 0.5, %v1194_v42  ;;  %v1781_v27 = vld [vmem:[#allocation2 + $0x98] sm:$0xff] }
 0x26c   : > { %v2977_v25 = vpop.eup %1775  ;;  %v1317_v24 = vadd.f32 %v1285_v5, %v1253_v19  ;;  %v1167_v45 = vmul.f32 %v2924_v34, %v1166_v52  ;;  %v1184_v10 = vmul.f32 %v2955_v59, %v1183_v23  ;;  %v1206_v46 = vsub.f32 1.5, %v1205_v13  ;;  %v1295_v5 = vld [vmem:[%s2291_s7 + $0xf8] sm:$0xff]  ;;  %v1294_v52 = vld [vmem:[%s2291_s7 + $0xf0] sm:$0xff]  ;;  %v1782_v23 = vld [vmem:[#allocation2 + $0x20] sm:$0xff] }
 0x26d   : > { %v1181_v62 = vsel %vm1180_vm3, %v2915_v3, %v1177_v4  ;;  %v1157_v39 = vmul.f32 %v2929_v14, %v1156_v37  ;;  %v1223_v8 = vmul.f32 %v2969_v7, %v2920_v2  ;;  %v1196_v38 = vsub.f32 1.5, %v1195_v36  ;;  %v1293_v3 = vld [vmem:[%s2291_s7 + $0xe8] sm:$0xff] }
 0x26e   : > { %1349 = vst [vmem:[%s2297_s26 + $0xa8] sm:$0xff] %v1317_v24  ;;  %v1258_v40 = vmul.f32 %v1181_v62, %v2493_v49  ;;  %v1171_v26 = vsel %vm1170_vm4, %v2924_v34, %v1167_v45  ;;  %v1185_v58 = vmul.f32 0.5, %v1184_v10  ;;  %v1207_v16 = vmul.f32 %v2943_v20, %v1206_v46 }
 0x26f   : > { %v1257_v18 = vmul.f32 %v1171_v26, %v2495_v50  ;;  %v1161_v9 = vsel %vm1160_vm5, %v2929_v14, %v1157_v39  ;;  %v1224_v49 = vmul.f32 %v2969_v7, %v1223_v8  ;;  %v1197_v50 = vmul.f32 %v2949_v56, %v1196_v38  ;;  %v1292_v14 = vld [vmem:[%s2291_s7 + $0xe0] sm:$0xff] }
 0x270   : > { %v1322_v1 = vadd.f32 %v1290_v11, %v1258_v40  ;;  %v1256_v12 = vmul.f32 %v1777_v43, %v1161_v9  ;;  %v1186_v35 = vsub.f32 1.5, %v1185_v58  ;;  %v1211_v34 = vsel %vm1210_vm6, %v2943_v20, %v1207_v16 }
 0x271   : > { %v1321_v28 = vadd.f32 %v1289_v6, %v1257_v18  ;;  %vm1188_vm8 = vweird.f32 %v2907_v0  ;;  %v1225_v51 = vmul.f32 0.5, %v1224_v49  ;;  %v1261_v53 = vmul.f32 %v1778_v44, %v1211_v34 }
 0x272   : > { %1354 = vst [vmem:[%s2297_s26 + $0xd0] sm:$0xff] %v1322_v1  ;;  %v1320_v54 = vadd.f32 %v1288_v47, %v1256_v12  ;;  %v1201_v41 = vsel %vm1200_vm7, %v2949_v56, %v1197_v50  ;;  %v1187_v15 = vmul.f32 %v2955_v59, %v1186_v35  ;;  %vm1190_vm9 = vmor %vm1188_vm8, %vm1189_vm2  ;;  %vm1229_vm10 = vweird.f32 %v2969_v7 }
 0x273   : > { %1353 = vst [vmem:[%s2297_s26 + $0xc8] sm:$0xff] %v1321_v28  ;;  %v1260_v22 = vmul.f32 %v1779_v55, %v1201_v41  ;;  %v1226_v21 = vsub.f32 1.5, %v1225_v51  ;;  %v1213_v0 = vmul.f32 %v2977_v25, %v2922_v31  ;;  %v1325_v20 = vadd.f32 %v1293_v3, %v1261_v53 }
 0x274   : > { %1352 = vst [vmem:[%s2297_s26 + $0xc0] sm:$0xff] %v1320_v54  ;;  %v1191_v56 = vsel %vm1190_vm9, %v2955_v59, %v1187_v15  ;;  %vm1228_vm11 = vweird.f32 %v2920_v2  ;;  %vm1219_vm13 = vweird.f32 %v2977_v25  ;;  %vm1218_vm14 = vweird.f32 %v2922_v31 }
 0x275   : > { %v1324_v60 = vadd.f32 %v1292_v14, %v1260_v22  ;;  %v1259_v32 = vmul.f32 %v1780_v61, %v1191_v56  ;;  %v1227_v33 = vmul.f32 %v2969_v7, %v1226_v21  ;;  %v1214_v57 = vmul.f32 %v2977_v25, %v1213_v0  ;;  %1357 = vst [vmem:[%s2297_s26 + $0xe8] sm:$0xff] %v1325_v20  ;;  %vm1230_vm12 = vmor %vm1228_vm11, %vm1229_vm10 }
 0x276   : > { %vm1220_vm15 = vmor %vm1218_vm14, %vm1219_vm13 }
 0x277   : > { %1356 = vst [vmem:[%s2297_s26 + $0xe0] sm:$0xff] %v1324_v60  ;;  %v1323_v48 = vadd.f32 %v1291_v63, %v1259_v32  ;;  %v1231_v29 = vsel %vm1230_vm12, %v2969_v7, %v1227_v33  ;;  %v1215_v59 = vmul.f32 0.5, %v1214_v57 }
 0x278   : > { %v1263_v2 = vmul.f32 %v1781_v27, %v1231_v29 }
 0x279   : > { %1355 = vst [vmem:[%s2297_s26 + $0xd8] sm:$0xff] %v1323_v48  ;;  %v1216_v30 = vsub.f32 1.5, %v1215_v59 }
 0x27a   : > { %v1327_v17 = vadd.f32 %v1295_v5, %v1263_v2 }
 0x27b   : > { %v1217_v19 = vmul.f32 %v2977_v25, %v1216_v30 }
 0x27c   : > { %1359 = vst [vmem:[%s2297_s26 + $0xf8] sm:$0xff] %v1327_v17 }
 0x27d   : > { %v1221_v42 = vsel %vm1220_vm15, %v2977_v25, %v1217_v19 }
 0x27e   : > { %v1262_v7 = vmul.f32 %v1782_v23, %v1221_v42 }
 0x280   : > { %v1326_v4 = vadd.f32 %v1294_v52, %v1262_v7 }
 0x282   : > { %1358 = vst [vmem:[%s2297_s26 + $0xf0] sm:$0xff] %v1326_v4 }
 0x283 PF: > { %s1536_s21 = sshll.u32 %s2015_s22, 8  ;;  %s3154_s15 = sld [smem:[#allocation23_spill]] }
 0x284   : > { %s1373_s30 = sshll.u32 %s2297_s26, 4  ;;  %s1361_s18 = scalar_lea.sflag [#allocation5], %s253_s29  ;;  %s1374_s30 = int_to_ptr.vmem [resolvable:$true] %s1373_s30 }
 0x289   : > { %s3155_s6 = smov %s3154_s15  ;;  %s1372_s1 = scalar_lea.hbm %s3154_s15, %s1536_s21 }
 0x28a   : > { %s1375_s3 = sshll.u32 %s1372_s1, 4  ;;  %s1893_s22 = scalar_lea.hbm %s3155_s6, 512  ;;  %s1376_s3 = int_to_ptr.hbm [resolvable:$true] %s1375_s3 }
 0x28b   : > { %s1887_s9 = sshra.s32 %s1376_s3, 4  ;;  %s1888_s9 = int_to_ptr.hbm [resolvable:$true] %s1887_s9 }
 0x28c   : > { %s1889_s11 = scalar_lea.hbm %s1888_s9, 256  ;;  %p1894_p12 = scmp.lt.s32.totalorder %s1888_s9, %s3155_s6 }
 0x28d   : > { %p1890_p11 = scmp.ne.s32.totalorder %s1888_s9, %s1889_s11  ;;  %p1895_p13 = scmp.lt.s32.totalorder %s1893_s22, %s1889_s11 }
 0x28f   : > { %p1891_p3 = pnand %p1890_p11, %p2251_p9  ;;  %p1896_p0 = por %p1895_p13, %p1894_p12 }
 0x291   : > { %p1892_p7 = pneg %p1891_p3 }
 0x293   : > { %p1897_p4 = pnand %p1896_p0, %p1892_p7 }
 0x295   : > { %1900 = shalt.err (!%p1897_p4)
}
 0x296   : > { %s2035_s29 = smov 128   ;;  %s2036_s4 = smov 8  }
 0x297   : > { %1575 = dma.vmem_to_hbm [thread:$0]  (%p2251_p9), %s1374_s30, 4096, %s1376_s3, %s1361_s18, %s2035_s29, %s2035_s29, %s2036_s4  }
 0x298 PF: > { %p1592_p5 = scmp.ge.s32.totalorder %s2027_s25, 2  ;;  %s1390_s7 = sand.u32 1, %s1975_s12  }
 0x299   : > { %s1391_s26 = scalar_lea.sflag [#allocation5], %s1390_s7 }
 0x29a   : > { %p1588_p6 = pnand %p1592_p5, %p2255_p1 }
 0x29c   : > { %p1589_p2 = pneg %p1588_p6 }
 0x29e   : > { %1970 = dma.done.wait (%p1589_p2), %s1391_s26, 4096  }
 0x29f   : > { %1972 = vsyncadd (%p1589_p2), %s1391_s26, 4294963200  ;;  %s22_s25 = sadd.s32 1, %s2027_s25   ;;  %s3157_s5 = sld [smem:[#allocation14_spill]] }
 0x2a0   : > { %p3069_p10 = scmp.ge.s32.totalorder %s22_s25, 6   ;;  %s3158_s17 = sld [smem:[#allocation19_spill]] }
 0x2a1   : > { %s3159_s8 = sld [smem:[#allocation15_spill]]  ;;  %s3165_s12 = smov %s1979_s13 }
 0x2a2   : > { %s3160_s20 = sld [smem:[#allocation20_spill]]  ;;  %s3166_s13 = smov %s1983_s14 }
 0x2a3   : > { %s3161_s10 = sld [smem:[#allocation16_spill]]  ;;  %s3167_s14 = smov %s2233_s23 }
 0x2a4   : > { %s3162_s1 = sld [smem:[#allocation17_spill]]  ;;  %s3168_s15 = smov %s1991_s16 }
 0x2a5   : > { %s3163_s30 = sld [smem:[#allocation18_spill]]  ;;  %s3169_s16 = smov %s3157_s5 }
 0x2a6   : > { %s3170_s18 = smov %s2003_s19  ;;  %s3173_s22 = smov %s2023_s24 }
 0x2a7   : > { %s3171_s19 = smov %s3159_s8  ;;  %21 = sbr.rel (!%p3069_p10) target bundleno = 16 (0x10), region = 109 }
 0x2a9   : > { %s3172_s21 = smov %s3161_s10 }
 0x2aa   : > { %s3174_s23 = smov %s3162_s1 }
 0x2ab   : > { %s3175_s24 = smov %s3163_s30 }
 0x2ac   :  { %1397 = vsyncpa [#allocation4], 1 }
 0x2ad   :  { %1399 = vsyncpa [#allocation4 + $0x1], 1 }
 0x2ae   :  { %1400 = vsyncpa [#allocation7], 1 }
 0x2af   :  { %1402 = vsyncpa [#allocation7 + $0x1], 1 }
 0x2b0   :  { %1403 = vsyncpa [#allocation5], 1 }
 0x2b1   :  { %1405 = vsyncpa [#allocation5 + $0x1], 1 }

</bundles_post_ra>
